<compile_context>
chip_gen: v6e
topology: v6e:2x2x1
jax: 0.10.0
libtpu: 0.0.40
codegen_flags: <defaults>
</compile_context>

<pallas_src>
import functools

import numpy as np

import jax
import jax.numpy as jnp
from jax import lax
from jax.experimental import pallas as pl
from jax.experimental.pallas import tpu as pltpu

LANES = 128      # TPU lane width; alignment unit for padded feature dims.
SUBLANES = 8     # vreg sublane count; height of the packed output block.


def _round_up(x, m):
    return ((x + m - 1) // m) * m


# ------------------------------ fused kernel --------------------------------

def _fused_kernel(*refs, inv_tau, score_clip, dedup):
    """Per row-tile: text MLP -> item_e update -> dot score -> BCE terms.

    Ref order (dedup=True):  text, item, user, expand, meta, w1, b1, w2, b2, out
    Ref order (dedup=False): text, item, user,         meta, w1, b1, w2, b2, out
    """
    if dedup:
        (text_ref, item_ref, user_ref, expand_ref, meta_ref,
         w1_ref, b1_ref, w2_ref, b2_ref, out_ref) = refs
    else:
        (text_ref, item_ref, user_ref, meta_ref,
         w1_ref, b1_ref, w2_ref, b2_ref, out_ref) = refs
        expand_ref = None

    tile_n = text_ref.shape[0]

    # ---- text_mlp: Linear(T,2E) -> GELU(exact erf) -> Linear(2E,E) on the MXU.
    # Operands bf16 (native MXU dtype), accumulation f32.
    te = text_ref[...]                                                  # (TN, Tp) bf16
    h = jnp.dot(te, w1_ref[...], preferred_element_type=jnp.float32)    # (TN, Hp) f32
    h = h + b1_ref[...]
    h = 0.5 * h * (1.0 + lax.erf(h * 0.7071067811865475))               # torch.nn.GELU()
    # TODO(synk): v5e only - switch to tanh-approx GELU if VALU-bound (EUP slot free).
    proj = jnp.dot(h.astype(jnp.bfloat16), w2_ref[...],
                   preferred_element_type=jnp.float32) + b2_ref[...]    # (TN, Ep) f32

    item_total = item_ref[...].astype(jnp.float32) + proj               # (TN, Ep) f32

    # ---- user rows: deduplicated (TN//G, Ep) block expanded to per-item rows by a
    # pinned 0/1 expansion matmul (exact: single nonzero per row); or direct load.
    if expand_ref is not None:
        u_rep = jnp.dot(expand_ref[...], user_ref[...],
                        preferred_element_type=jnp.float32)             # (TN, Ep) f32
    else:
        u_rep = user_ref[...].astype(jnp.float32)                       # (TN, Ep) f32

    # ---- score: sum_E(item_total * user).  A ones-vector contraction on the MXU
    # yields the result directly in lane-dense row orientation (8 identical rows),
    # avoiding any (TN,1)->(1,TN) relayout.
    m = item_total * u_rep                                               # (TN, Ep) f32
    ones_lhs = jnp.ones((SUBLANES, m.shape[1]), dtype=jnp.float32)
    s = lax.dot_general(ones_lhs, m, (((1,), (1,)), ((), ())),
                        preferred_element_type=jnp.float32)              # (8, TN) f32

    meta = meta_ref[...]                                                 # (2, TN) f32
    bias_row = meta[0:1, :]            # user_bias + item_bias, per row
    label_row = meta[1:2, :]           # labels, per row

    s = s + bias_row
    if score_clip > 0:                 # SCORE_CLIP convention (disabled when <= 0)
        s = jnp.clip(s, -score_clip, score_clip)
    s = s * inv_tau

    # ---- BCE (loss_type='bce') in stable logits form, per-element terms:
    #   -(y log sigmoid(s) + (1-y) log(1-sigmoid(s))) = max(s,0) - s*y + log1p(e^-|s|)
    le = jnp.maximum(s, 0.0) - s * label_row + jnp.log1p(jnp.exp(-jnp.abs(s)))

    # ---- Pack scores (sublanes 0..3) and loss terms (sublanes 4..7) into one
    # lane-dense (8, TN) block: a single full-width store, 32 B/row total.
    row_id = lax.broadcasted_iota(jnp.int32, (SUBLANES, tile_n), 0)
    out_ref[0] = jnp.where(row_id < 4, s, le)


def fused_forward(text_e, item_e, user_e, expand, meta, w1, b1, w2, b2,
                  *, tile_n, tau, score_clip):
    n_pad, tp = text_e.shape
    ep = item_e.shape[1]
    hp = w1.shape[1]
    num_tiles = n_pad // tile_n
    dedup = expand is not None

    kernel = functools.partial(
        _fused_kernel,
        inv_tau=1.0 / float(tau),
        score_clip=float(score_clip),
        dedup=dedup)

    row = lambda i: (i, 0)      # tiled over item rows
    pin = lambda i: (0, 0)      # pinned (weights / expansion matrix stay in VMEM)

    in_specs = [
        pl.BlockSpec((tile_n, tp), row),                  # text_e (bf16)
        pl.BlockSpec((tile_n, ep), row),                  # item_e (bf16)
    ]
    operands = [text_e, item_e]
    if dedup:
        tb = expand.shape[1]                              # = tile_n // group_size
        in_specs += [
            pl.BlockSpec((tb, ep), row),                  # user_e, one row per user (bf16)
            pl.BlockSpec((tile_n, tb), pin),              # 0/1 expansion matrix (bf16)
        ]
        operands += [user_e, expand]
    else:
        in_specs.append(pl.BlockSpec((tile_n, ep), row))  # user_e per item row (bf16)
        operands.append(user_e)
    in_specs += [
        pl.BlockSpec((2, tile_n), lambda i: (0, i)),      # [bias; labels], lane-dense
        pl.BlockSpec((tp, hp), pin),                      # w1 (bf16)
        pl.BlockSpec((1, hp), pin),                       # b1
        pl.BlockSpec((hp, ep), pin),                      # w2 (bf16)
        pl.BlockSpec((1, ep), pin),                       # b2
    ]
    operands += [meta, w1, b1, w2, b2]

    return pl.pallas_call(
        kernel,
        grid=(num_tiles,),
        in_specs=in_specs,
        out_specs=pl.BlockSpec((1, SUBLANES, tile_n), lambda i: (i, 0, 0)),
        out_shape=jax.ShapeDtypeStruct((num_tiles, SUBLANES, tile_n), jnp.float32),
        compiler_params=pltpu.CompilerParams(
            # No carried state across the grid -> fully parallel (uses both v7x TCs).
            dimension_semantics=("parallel",)),
    )(*operands)


# ------------------------------ model wrapper --------------------------------

class AbstractRecommenderPallas:
    """Deterministic, synthetic-parameter version of AbstractRecommender."""

    def __init__(self, n_users, n_items, embedding_size, text_emb_size,
                 init_std=0.1, tau=1.0, score_clip=-1.0, seed=0, tile_n=512):
        assert tile_n % LANES == 0
        self.tau = float(tau)
        self.score_clip = float(score_clip)
        self.tile_n = int(tile_n)
        self.e, self.t = embedding_size, text_emb_size
        # MXU-friendly padded sizes (zero padding keeps results identical).
        self.ep = _round_up(embedding_size, LANES)
        self.tp = _round_up(text_emb_size, LANES)
        self.hp = _round_up(2 * embedding_size, LANES)

        key = jax.random.PRNGKey(seed)
        ks = jax.random.split(key, 8)

        def padded_normal(k, shape, pshape, std=init_std):
            w = jnp.zeros(pshape, jnp.float32)
            vals = (std * jax.random.normal(k, shape)).astype(jnp.float32)
            return w.at[tuple(slice(0, s) for s in shape)].set(vals)

        e, t, ep, tp, hp = self.e, self.t, self.ep, self.tp, self.hp
        # nn.Embedding(..., padding_idx=0): row 0 forced to zero (also used for
        # zero-cost row padding).  Tables stored bf16 = kernel transport dtype
        # (small, documented drift vs. the f32 PyTorch reference).
        self.user_embedding = padded_normal(ks[0], (n_users, e), (n_users, ep)
                                            ).at[0].set(0.0).astype(jnp.bfloat16)
        self.item_embedding = padded_normal(ks[1], (n_items, e), (n_items, ep)
                                            ).at[0].set(0.0).astype(jnp.bfloat16)
        self.text_embedding = padded_normal(ks[2], (n_items, t), (n_items, tp)
                                            ).at[0].set(0.0).astype(jnp.bfloat16)
        # text_mlp = Linear(T,2E) -> GELU -> Linear(2E,E); weights bf16 (MXU
        # operands), biases zero-init (matches normal_initialization).
        self.w1 = padded_normal(ks[3], (t, 2 * e), (tp, hp)).astype(jnp.bfloat16)
        self.b1 = jnp.zeros((1, hp), jnp.float32)
        self.w2 = padded_normal(ks[4], (2 * e, e), (hp, ep)).astype(jnp.bfloat16)
        self.b2 = jnp.zeros((1, ep), jnp.float32)
        # user_bias / item_bias ~ N(0, 0.1)
        self.user_bias = (0.1 * jax.random.normal(ks[5], (n_users,))).astype(jnp.float32)
        self.item_bias = (0.1 * jax.random.normal(ks[6], (n_items,))).astype(jnp.float32)
        self._expand_cache = {}

    def _expand_matrix(self, group):
        """(TILE_N, TILE_N//group) 0/1 matrix mapping user row -> item rows."""
        if group not in self._expand_cache:
            tb = self.tile_n // group
            rows = np.arange(self.tile_n)[:, None] // group
            cols = np.arange(tb)[None, :]
            self._expand_cache[group] = jnp.asarray(rows == cols, dtype=jnp.bfloat16)
        return self._expand_cache[group]

    def __call__(self, user_ids, item_ids, labels):
        b, g = item_ids.shape
        n = b * g
        n_pad = _round_up(n, self.tile_n)
        pad = n_pad - n

        # Flatten to N = B*G rows; pad with id 0 (zero embedding rows; padded rows
        # are sliced off the outputs, so no masking is needed in-kernel).
        iid = jnp.pad(item_ids.reshape(n), (0, pad))
        uid_rows = jnp.pad(jnp.repeat(user_ids, g), (0, pad))

        # Glue: embedding-table gathers (bf16 transport).
        # TODO(synk): move these gathers into the kernel (scalar-prefetched ids +
        # manual DMA from pl.ANY tables) to avoid the HBM round-trip.
        item_e = self.item_embedding[iid]                              # (Np, Ep) bf16
        text_e = self.text_embedding[iid]                              # (Np, Tp) bf16

        dedup = (g > 1) and (self.tile_n % g == 0) and ((self.tile_n // g) % SUBLANES == 0)
        if dedup:
            b_pad = n_pad // g
            uid = jnp.pad(user_ids, (0, b_pad - b))
            user_e = self.user_embedding[uid]                          # (Bp, Ep) bf16
            expand = self._expand_matrix(g)
        else:
            user_e = self.user_embedding[uid_rows]                     # (Np, Ep) bf16
            expand = None

        bias = self.user_bias[uid_rows] + self.item_bias[iid]          # (Np,) f32
        lab = jnp.pad(labels.astype(jnp.float32).reshape(n), (0, pad)) # (Np,) f32
        meta = jnp.stack([bias, lab], axis=0)                          # (2, Np) lane-dense

        out = fused_forward(
            text_e, item_e, user_e, expand, meta,
            self.w1, self.b1, self.w2, self.b2,
            tile_n=self.tile_n, tau=self.tau, score_clip=self.score_clip)

        # out: (num_tiles, 8, TILE_N); sublane 0 = scores, sublane 4 = BCE terms.
        flat_scores = out[:, 0, :].reshape(-1)[:n]
        flat_loss = out[:, 4, :].reshape(-1)[:n]
        return flat_scores.reshape(b, g), flat_loss.mean()


# TODO(synk): forward()/predict()/_predict_layer() are abstract in the reference;
# file-based pretrained item/text embedding loading, logging, and the non-BCE
# loss branches (BPR/CCL/SOFTMAX/FULLSOFTMAX) are intentionally omitted.

if __name__ == "__main__":
    N_USERS, N_ITEMS = 50, 100
    EMB, TEXT_EMB = 32, 64
    BATCH, GROUP = 8, 4

    model = AbstractRecommenderPallas(N_USERS, N_ITEMS, EMB, TEXT_EMB, seed=0)

    key = jax.random.PRNGKey(0)
    k1, k2, k3 = jax.random.split(key, 3)
    user_ids = jax.random.randint(k1, (BATCH,), 1, N_USERS, dtype=jnp.int32)
    item_ids = jax.random.randint(k2, (BATCH, GROUP), 1, N_ITEMS, dtype=jnp.int32)
    labels = (jax.random.uniform(k3, (BATCH, GROUP)) > 0.5).astype(jnp.float32)

    scores, loss = model(user_ids, item_ids, labels)
    jax.block_until_ready((scores, loss))
    assert scores.shape == (BATCH, GROUP) and loss.shape == ()
    assert bool(jnp.isfinite(loss)) and bool(jnp.all(jnp.isfinite(scores)))
    print("KERNEL_OK")
</pallas_src>

<mosaic_0001>
module attributes {stable_mosaic.version = 11 : i64} {
  func.func @_fused_kernel(%arg0: i32, %arg1: memref<512x128xbf16, #tpu.memory_space<vmem>>, %arg2: memref<512x128xbf16, #tpu.memory_space<vmem>>, %arg3: memref<128x128xbf16, #tpu.memory_space<vmem>>, %arg4: memref<512x128xbf16, #tpu.memory_space<vmem>>, %arg5: memref<2x512xf32, #tpu.memory_space<vmem>>, %arg6: memref<128x128xbf16, #tpu.memory_space<vmem>>, %arg7: memref<1x128xf32, #tpu.memory_space<vmem>>, %arg8: memref<128x128xbf16, #tpu.memory_space<vmem>>, %arg9: memref<1x128xf32, #tpu.memory_space<vmem>>, %arg10: memref<1x8x512xf32, #tpu.memory_space<vmem>>) attributes {dimension_semantics = [#tpu.dimension_semantics<parallel>], iteration_bounds = array<i64: 1>, scalar_prefetch = 0 : i64, scratch_operands = 0 : i64, tpu.core_type = #tpu.core_type<tc>, window_params = [{transform_indices = @transform_0, window_bounds = array<i64: 512, 128>}, {transform_indices = @transform_1, window_bounds = array<i64: 512, 128>}, {transform_indices = @transform_2, window_bounds = array<i64: 128, 128>}, {pipeline_mode = #tpu.pipeline_mode<synchronous>, transform_indices = @transform_3, window_bounds = array<i64: 512, 128>}, {transform_indices = @transform_4, window_bounds = array<i64: 2, 512>}, {pipeline_mode = #tpu.pipeline_mode<synchronous>, transform_indices = @transform_5, window_bounds = array<i64: 128, 128>}, {pipeline_mode = #tpu.pipeline_mode<synchronous>, transform_indices = @transform_6, window_bounds = array<i64: 1, 128>}, {pipeline_mode = #tpu.pipeline_mode<synchronous>, transform_indices = @transform_7, window_bounds = array<i64: 128, 128>}, {pipeline_mode = #tpu.pipeline_mode<synchronous>, transform_indices = @transform_8, window_bounds = array<i64: 1, 128>}, {transform_indices = @transform_9, window_bounds = array<i64: 1, 8, 512>}]} {
    %c0 = arith.constant 0 : index
    %c0_0 = arith.constant 0 : index
    %0 = vector.load %arg1[%c0, %c0_0] : memref<512x128xbf16, #tpu.memory_space<vmem>>, vector<512x128xbf16>
    %c0_1 = arith.constant 0 : index
    %c0_2 = arith.constant 0 : index
    %1 = vector.load %arg6[%c0_1, %c0_2] : memref<128x128xbf16, #tpu.memory_space<vmem>>, vector<128x128xbf16>
    %cst = arith.constant dense<0.000000e+00> : vector<512x128xf32>
    %2 = tpu.matmul %0, %1, %cst {dimension_numbers = #tpu.dot_dimension_numbers<[1], [0], [0], [1], [0, 0, 1, 1], [], []>} : vector<512x128xbf16>, vector<128x128xbf16>, vector<512x128xf32> -> vector<512x128xf32>
    %c0_3 = arith.constant 0 : index
    %c0_4 = arith.constant 0 : index
    %3 = vector.load %arg7[%c0_3, %c0_4] : memref<1x128xf32, #tpu.memory_space<vmem>>, vector<1x128xf32>
    %4 = vector.broadcast %3 : vector<1x128xf32> to vector<512x128xf32>
    %5 = arith.addf %2, %4 : vector<512x128xf32>
    %cst_5 = arith.constant 5.000000e-01 : f32
    %6 = vector.broadcast %cst_5 : f32 to vector<512x128xf32>
    %7 = arith.mulf %6, %5 : vector<512x128xf32>
    %cst_6 = arith.constant 0.707106769 : f32
    %8 = vector.broadcast %cst_6 : f32 to vector<512x128xf32>
    %9 = arith.mulf %5, %8 : vector<512x128xf32>
    %10 = math.erf %9 : vector<512x128xf32>
    %cst_7 = arith.constant 1.000000e+00 : f32
    %11 = vector.broadcast %cst_7 : f32 to vector<512x128xf32>
    %12 = arith.addf %11, %10 : vector<512x128xf32>
    %13 = arith.mulf %7, %12 : vector<512x128xf32>
    %14 = arith.truncf %13 : vector<512x128xf32> to vector<512x128xbf16>
    %c0_8 = arith.constant 0 : index
    %c0_9 = arith.constant 0 : index
    %15 = vector.load %arg8[%c0_8, %c0_9] : memref<128x128xbf16, #tpu.memory_space<vmem>>, vector<128x128xbf16>
    %cst_10 = arith.constant dense<0.000000e+00> : vector<512x128xf32>
    %16 = tpu.matmul %14, %15, %cst_10 {dimension_numbers = #tpu.dot_dimension_numbers<[1], [0], [0], [1], [0, 0, 1, 1], [], []>} : vector<512x128xbf16>, vector<128x128xbf16>, vector<512x128xf32> -> vector<512x128xf32>
    %c0_11 = arith.constant 0 : index
    %c0_12 = arith.constant 0 : index
    %17 = vector.load %arg9[%c0_11, %c0_12] : memref<1x128xf32, #tpu.memory_space<vmem>>, vector<1x128xf32>
    %18 = vector.broadcast %17 : vector<1x128xf32> to vector<512x128xf32>
    %19 = arith.addf %16, %18 : vector<512x128xf32>
    %c0_13 = arith.constant 0 : index
    %c0_14 = arith.constant 0 : index
    %20 = vector.load %arg2[%c0_13, %c0_14] : memref<512x128xbf16, #tpu.memory_space<vmem>>, vector<512x128xbf16>
    %21 = arith.extf %20 : vector<512x128xbf16> to vector<512x128xf32>
    %22 = arith.addf %21, %19 : vector<512x128xf32>
    %c0_15 = arith.constant 0 : index
    %c0_16 = arith.constant 0 : index
    %23 = vector.load %arg4[%c0_15, %c0_16] : memref<512x128xbf16, #tpu.memory_space<vmem>>, vector<512x128xbf16>
    %c0_17 = arith.constant 0 : index
    %c0_18 = arith.constant 0 : index
    %24 = vector.load %arg3[%c0_17, %c0_18] : memref<128x128xbf16, #tpu.memory_space<vmem>>, vector<128x128xbf16>
    %cst_19 = arith.constant dense<0.000000e+00> : vector<512x128xf32>
    %25 = tpu.matmul %23, %24, %cst_19 {dimension_numbers = #tpu.dot_dimension_numbers<[1], [0], [0], [1], [0, 0, 1, 1], [], []>} : vector<512x128xbf16>, vector<128x128xbf16>, vector<512x128xf32> -> vector<512x128xf32>
    %26 = arith.mulf %22, %25 : vector<512x128xf32>
    %cst_20 = arith.constant 1.000000e+00 : f32
    %27 = vector.broadcast %cst_20 : f32 to vector<8x128xf32>
    %cst_21 = arith.constant dense<0.000000e+00> : vector<8x512xf32>
    %28 = tpu.matmul %27, %26, %cst_21 {dimension_numbers = #tpu.dot_dimension_numbers<[1], [1], [0], [0], [0, 0, 1, 0], [], []>} : vector<8x128xf32>, vector<512x128xf32>, vector<8x512xf32> -> vector<8x512xf32>
    %c0_22 = arith.constant 0 : index
    %c0_23 = arith.constant 0 : index
    %29 = vector.load %arg5[%c0_22, %c0_23] : memref<2x512xf32, #tpu.memory_space<vmem>>, vector<2x512xf32>
    %30 = vector.extract_strided_slice %29 {offsets = [0, 0], sizes = [1, 512], strides = [1, 1]} : vector<2x512xf32> to vector<1x512xf32>
    %31 = vector.extract_strided_slice %29 {offsets = [1, 0], sizes = [1, 512], strides = [1, 1]} : vector<2x512xf32> to vector<1x512xf32>
    %32 = vector.broadcast %30 : vector<1x512xf32> to vector<8x512xf32>
    %33 = arith.addf %28, %32 : vector<8x512xf32>
    %cst_24 = arith.constant 1.000000e+00 : f32
    %34 = vector.broadcast %cst_24 : f32 to vector<8x512xf32>
    %35 = arith.mulf %33, %34 : vector<8x512xf32>
    %cst_25 = arith.constant 0.000000e+00 : f32
    %36 = vector.broadcast %cst_25 : f32 to vector<8x512xf32>
    %37 = arith.maximumf %35, %36 : vector<8x512xf32>
    %38 = vector.broadcast %31 : vector<1x512xf32> to vector<8x512xf32>
    %39 = arith.mulf %35, %38 : vector<8x512xf32>
    %40 = arith.subf %37, %39 : vector<8x512xf32>
    %41 = math.absf %35 : vector<8x512xf32>
    %cst_26 = arith.constant 0.000000e+00 : f32
    %42 = vector.broadcast %cst_26 : f32 to vector<8x512xf32>
    %43 = arith.subf %42, %41 : vector<8x512xf32>
    %44 = math.exp %43 : vector<8x512xf32>
    %45 = math.log1p %44 : vector<8x512xf32>
    %46 = arith.addf %40, %45 : vector<8x512xf32>
    %47 = tpu.iota {dimensions = array<i32: 0>} : vector<8x512xi32>
    %c4_i32 = arith.constant 4 : i32
    %48 = vector.broadcast %c4_i32 : i32 to vector<8x512xi32>
    %49 = arith.cmpi slt, %47, %48 : vector<8x512xi32>
    %50 = arith.select %49, %35, %46 : vector<8x512xi1>, vector<8x512xf32>
    %c0_27 = arith.constant 0 : index
    %c0_28 = arith.constant 0 : index
    %c0_29 = arith.constant 0 : index
    %51 = vector.load %arg10[%c0_27, %c0_28, %c0_29] : memref<1x8x512xf32, #tpu.memory_space<vmem>>, vector<1x8x512xf32>
    %52 = vector.shape_cast %51 : vector<1x8x512xf32> to vector<8x512xf32>
    %53 = vector.shape_cast %50 : vector<8x512xf32> to vector<1x8x512xf32>
    tpu.vector_store %arg10[%c0_27, %c0_28, %c0_29], %53 {strides = array<i32>} : memref<1x8x512xf32, #tpu.memory_space<vmem>>, vector<1x8x512xf32>,
    return
  }
  func.func @transform_0(%arg0: i32) -> (i32, i32) {
    %c0_i32 = arith.constant 0 : i32
    %c0_i32_0 = arith.constant 0 : i32
    return %arg0, %c0_i32 : i32, i32
  }
  func.func @transform_1(%arg0: i32) -> (i32, i32) {
    %c0_i32 = arith.constant 0 : i32
    %c0_i32_0 = arith.constant 0 : i32
    return %arg0, %c0_i32 : i32, i32
  }
  func.func @transform_2(%arg0: i32) -> (i32, i32) {
    %c0_i32 = arith.constant 0 : i32
    %c0_i32_0 = arith.constant 0 : i32
    return %arg0, %c0_i32 : i32, i32
  }
  func.func @transform_3(%arg0: i32) -> (i32, i32) {
    %c0_i32 = arith.constant 0 : i32
    %c0_i32_0 = arith.constant 0 : i32
    %c0_i32_1 = arith.constant 0 : i32
    return %c0_i32, %c0_i32_0 : i32, i32
  }
  func.func @transform_4(%arg0: i32) -> (i32, i32) {
    %c0_i32 = arith.constant 0 : i32
    %c0_i32_0 = arith.constant 0 : i32
    return %c0_i32, %arg0 : i32, i32
  }
  func.func @transform_5(%arg0: i32) -> (i32, i32) {
    %c0_i32 = arith.constant 0 : i32
    %c0_i32_0 = arith.constant 0 : i32
    %c0_i32_1 = arith.constant 0 : i32
    return %c0_i32, %c0_i32_0 : i32, i32
  }
  func.func @transform_6(%arg0: i32) -> (i32, i32) {
    %c0_i32 = arith.constant 0 : i32
    %c0_i32_0 = arith.constant 0 : i32
    %c0_i32_1 = arith.constant 0 : i32
    return %c0_i32, %c0_i32_0 : i32, i32
  }
  func.func @transform_7(%arg0: i32) -> (i32, i32) {
    %c0_i32 = arith.constant 0 : i32
    %c0_i32_0 = arith.constant 0 : i32
    %c0_i32_1 = arith.constant 0 : i32
    return %c0_i32, %c0_i32_0 : i32, i32
  }
  func.func @transform_8(%arg0: i32) -> (i32, i32) {
    %c0_i32 = arith.constant 0 : i32
    %c0_i32_0 = arith.constant 0 : i32
    %c0_i32_1 = arith.constant 0 : i32
    return %c0_i32, %c0_i32_0 : i32, i32
  }
  func.func @transform_9(%arg0: i32) -> (i32, i32, i32) {
    %c0_i32 = arith.constant 0 : i32
    %c0_i32_0 = arith.constant 0 : i32
    %c0_i32_1 = arith.constant 0 : i32
    return %arg0, %c0_i32, %c0_i32_0 : i32, i32, i32
  }
}

</mosaic_0001>

<bundles_post_ra>
// kernel: tpu_custom_call.1
= control target key start
LH: loop header
LB: loop body
LE: loop exit
PB: predicated region body
PF: predicated region fallthrough
CT: control target
= control target key end

     0   :  { %14 = vsyncpa [#allocation3], 0  ;;  %s4596_s0 = inlined_call_operand.hbm [shape: bf16[512,128], index: 0, kind: input, shape index: {}]   ;;  %s4597_s1 = inlined_call_operand.hbm [shape: bf16[512,128], index: 1, kind: input, shape index: {}]   ;;  %s4598_s2 = inlined_call_operand.hbm [shape: bf16[128,128], index: 2, kind: input, shape index: {}]   ;;  %s4599_s3 = inlined_call_operand.hbm [shape: bf16[512,128], index: 3, kind: input, shape index: {}]   ;;  %s4600_s4 = inlined_call_operand.hbm [shape: f32[2,512], index: 4, kind: input, shape index: {}]   ;;  %s4601_s5 = inlined_call_operand.hbm [shape: bf16[128,128], index: 5, kind: input, shape index: {}]   ;;  %s4602_s6 = inlined_call_operand.vmem [shape: f32[1,128], index: 6, kind: input, shape index: {}]   ;;  %s4603_s7 = inlined_call_operand.hbm [shape: bf16[128,128], index: 7, kind: input, shape index: {}]   ;;  %s4604_s8 = inlined_call_operand.vmem [shape: f32[1,128], index: 8, kind: input, shape index: {}]   ;;  %s4605_s9 = inlined_call_operand.hbm [shape: f32[1,8,512], index: 9, kind: output, shape index: {}]  }
   0x1   :  { %15 = vsyncpa [#allocation6], 0 }
   0x2   :  { %16 = vsyncpa [#allocation9], 0 }
   0x3   :  { %17 = vsyncpa [#allocation12], 0 }
   0x4   :  { %18 = vsyncpa [#allocation4], 0  ;;  %s3724_s30 = smov [#allocation5]   ;;  %s3725_s11 = smov [#allocation8]  }
   0x5   :  { %s36_s10 = sshll.u32 %s3724_s30, 4  ;;  %s60_s12 = sshll.u32 %s3725_s11, 4  ;;  %s37_s10 = int_to_ptr.vmem [resolvable:$true] %s36_s10  ;;  %s61_s12 = int_to_ptr.vmem [resolvable:$true] %s60_s12 }
   0x6   :  { %s3562_s13 = scalar_lea.vmem %s37_s10, 4096  ;;  %p3567_p1 = scmp.lt.s32.totalorder %s37_s10, %s37_s10 }
   0x7   :  { %p3563_p0 = scmp.ne.s32.totalorder %s37_s10, %s3562_s13  ;;  %p3568_p2 = scmp.lt.s32.totalorder %s3562_s13, %s3562_s13 }
   0x9   :  { %p3569_p3 = por %p3568_p2, %p3567_p1 }
   0xb   :  { %p3570_p4 = pnand %p3569_p3, %p3563_p0 }
   0xd   :  { %3573 = shalt.err (!%p3570_p4)
}
   0xe   :  { %s3726_s14 = smov 64   ;;  %s3727_s15 = smov 4  }
   0xf   :  { %42 = dma.hbm_to_vmem [thread:$0]  %s4597_s1, 4096, %s37_s10, [#allocation6], %s3726_s14, %s3726_s14, %s3727_s15  }
  0x10   :  { %s3582_s18 = scalar_lea.vmem %s61_s12, 4096  ;;  %p3587_p6 = scmp.lt.s32.totalorder %s61_s12, %s61_s12 }
  0x11   :  { %p3583_p5 = scmp.ne.s32.totalorder %s61_s12, %s3582_s18  ;;  %p3588_p7 = scmp.lt.s32.totalorder %s3582_s18, %s3582_s18 }
  0x13   :  { %p3589_p8 = por %p3588_p7, %p3587_p6 }
  0x15   :  { %p3590_p9 = pnand %p3589_p8, %p3583_p5 }
  0x17   :  { %3593 = shalt.err (!%p3590_p9)
}
  0x18   :  { %66 = dma.hbm_to_vmem [thread:$0]  %s4599_s3, 4096, %s61_s12, [#allocation9], %s3726_s14, %s3726_s14, %s3727_s15  }
  0x19   :  { %s3728_s21 = smov [#allocation11]   ;;  %s3729_s23 = smov [#allocation2]  }
  0x1a   :  { %s82_s22 = sshll.u32 %s3728_s21, 4  ;;  %s24_s24 = sshll.u32 %s3729_s23, 4  ;;  %s83_s22 = int_to_ptr.vmem [resolvable:$true] %s82_s22  ;;  %s25_s24 = int_to_ptr.vmem [resolvable:$true] %s24_s24 }
  0x1b   :  { %s3602_s1 = scalar_lea.vmem %s83_s22, 1024  ;;  %p3607_p11 = scmp.lt.s32.totalorder %s83_s22, %s83_s22 }
  0x1c   :  { %p3603_p10 = scmp.ne.s32.totalorder %s83_s22, %s3602_s1  ;;  %p3608_p12 = scmp.lt.s32.totalorder %s3602_s1, %s3602_s1 }
  0x1e   :  { %p3609_p13 = por %p3608_p12, %p3607_p11 }
  0x20   :  { %p3610_p0 = pnand %p3609_p13, %p3603_p10 }
  0x22   :  { %3613 = shalt.err (!%p3610_p0)
}
  0x23   :  { %88 = dma.hbm_to_vmem [thread:$0]  %s4601_s5, 1024, %s83_s22, [#allocation12], %s3726_s14, %s3726_s14, %s3727_s15  }
  0x24   :  { %s3622_s3 = scalar_lea.vmem %s25_s24, 4096  ;;  %p3627_p2 = scmp.lt.s32.totalorder %s25_s24, %s25_s24 }
  0x25   :  { %p3623_p1 = scmp.ne.s32.totalorder %s25_s24, %s3622_s3  ;;  %p3628_p3 = scmp.lt.s32.totalorder %s3622_s3, %s3622_s3 }
  0x27   :  { %p3629_p4 = por %p3628_p3, %p3627_p2 }
  0x29   :  { %p3630_p5 = pnand %p3629_p4, %p3623_p1 }
  0x2b   :  { %3633 = shalt.err (!%p3630_p5)
}
  0x2c   :  { %30 = dma.hbm_to_vmem [thread:$0]  %s4596_s0, 4096, %s25_s24, [#allocation3], %s3726_s14, %s3726_s14, %s3727_s15  }
  0x2d   :  { %s3730_s29 = smov [#allocation7]   ;;  %s3731_s10 = smov [#allocation10]  }
  0x2e   :  { %s48_s30 = sshll.u32 %s3730_s29, 4  ;;  %s73_s11 = sshll.u32 %s3731_s10, 4  ;;  %s49_s30 = int_to_ptr.vmem [resolvable:$true] %s48_s30  ;;  %s74_s11 = int_to_ptr.vmem [resolvable:$true] %s73_s11 }
  0x2f   :  { %s3642_s5 = scalar_lea.vmem %s49_s30, 1024  ;;  %p3647_p7 = scmp.lt.s32.totalorder %s49_s30, %s49_s30 }
  0x30   :  { %p3643_p6 = scmp.ne.s32.totalorder %s49_s30, %s3642_s5  ;;  %p3648_p8 = scmp.lt.s32.totalorder %s3642_s5, %s3642_s5 }
  0x32   :  { %p3649_p9 = por %p3648_p8, %p3647_p7 }
  0x34   :  { %p3650_p10 = pnand %p3649_p9, %p3643_p6 }
  0x36   :  { %3653 = shalt.err (!%p3650_p10)
}
  0x37   :  { %54 = dma.hbm_to_vmem [thread:$0]  %s4598_s2, 1024, %s49_s30, [#allocation6], %s3726_s14, %s3726_s14, %s3727_s15  }
  0x38   :  { %s3662_s0 = scalar_lea.vmem %s74_s11, 128  ;;  %p3667_p12 = scmp.lt.s32.totalorder %s74_s11, %s74_s11 }
  0x39   :  { %p3663_p11 = scmp.ne.s32.totalorder %s74_s11, %s3662_s0  ;;  %p3668_p13 = scmp.lt.s32.totalorder %s3662_s0, %s3662_s0 }
  0x3b   :  { %p3669_p0 = por %p3668_p13, %p3667_p12 }
  0x3d   :  { %p3670_p1 = pnand %p3669_p0, %p3663_p11 }
  0x3f   :  { %3673 = shalt.err (!%p3670_p1)
}
  0x40   :  { %76 = dma.hbm_to_vmem [thread:$0]  %s4600_s4, 128, %s74_s11, [#allocation9]  }
  0x41   :  { %s3732_s18 = smov [#allocation13]  }
  0x42   :  { %s96_s19 = sshll.u32 %s3732_s18, 4  ;;  %s97_s19 = int_to_ptr.vmem [resolvable:$true] %s96_s19 }
  0x43   :  { %s3682_s20 = scalar_lea.vmem %s97_s19, 1024  ;;  %p3687_p3 = scmp.lt.s32.totalorder %s97_s19, %s97_s19 }
  0x44   :  { %p3683_p2 = scmp.ne.s32.totalorder %s97_s19, %s3682_s20  ;;  %p3688_p4 = scmp.lt.s32.totalorder %s3682_s20, %s3682_s20 }
  0x46   :  { %p3689_p5 = por %p3688_p4, %p3687_p3 }
  0x48   :  { %p3690_p6 = pnand %p3689_p5, %p3683_p2 }
  0x4a   :  { %3693 = shalt.err (!%p3690_p6)
}
  0x4b   :  { %102 = dma.hbm_to_vmem [thread:$0]  %s4603_s7, 1024, %s97_s19, [#allocation12], %s3726_s14, %s3726_s14, %s3727_s15  }
  0x4c   :  { %3714 = dma.done.wait [#allocation3], 4096  }
  0x4d   :  { %3715 = vsyncadd [#allocation3], 4294963200 }
  0x4e   :  { %3716 = dma.done.wait [#allocation6], 5120  }
  0x4f   :  { %3717 = vsyncadd [#allocation6], 4294962176 }
  0x50   :  { %3718 = dma.done.wait [#allocation9], 4224  }
  0x51   :  { %3719 = vsyncadd [#allocation9], 4294963072 }
  0x52   :  { %3720 = dma.done.wait [#allocation12], 2048  }
  0x53   :  { %3721 = vsyncadd [#allocation12], 4294965248  ;;  %v3321_v0 = vld [vmem:[#allocation11 + $0x38] sm:$0xff]   ;;  %v3322_v1 = vld [vmem:[#allocation11 + $0x30] sm:$0xff]  }
  0x54   :  { %3070 = vmatprep.subr.bf16.mxu0 %v3321_v0  ;;  %v3323_v2 = vld [vmem:[#allocation11 + $0x28] sm:$0xff]   ;;  %v3324_v3 = vld [vmem:[#allocation11 + $0x20] sm:$0xff]   ;;  %v3329_v4 = vld [vmem:[#allocation2] sm:$0xff]  }
  0x55   :  { %3071 = vmatpush3.bf16.msra.mxu0 %v3321_v0  ;;  %3086 = vmatprep.mubr.bf16.mxu0 %v3329_v4  ;;  %v3325_v5 = vld [vmem:[#allocation11 + $0x18] sm:$0xff]   ;;  %v3326_v6 = vld [vmem:[#allocation11 + $0x10] sm:$0xff]   ;;  %v3327_v7 = vld [vmem:[#allocation11 + $0x8] sm:$0xff]  }
  0x56   :  { %3072 = vmatprep.subr.bf16.mxu0 %v3322_v1  ;;  %v3328_v8 = vld [vmem:[#allocation11] sm:$0xff]   ;;  %v3331_v10 = vld [vmem:[#allocation2 + $0x10] sm:$0xff]   ;;  %v3332_v11 = vld [vmem:[#allocation2 + $0x18] sm:$0xff]  }
  0x57   :  { %v3330_v9 = vld [vmem:[#allocation2 + $0x8] sm:$0xff]   ;;  %v3333_v12 = vld [vmem:[#allocation2 + $0x20] sm:$0xff]   ;;  %v3361_v13 = vld [vmem:[#allocation7 + $0x38] sm:$0xff]  }
  0x58   :  { %v3362_v14 = vld [vmem:[#allocation7 + $0x30] sm:$0xff]   ;;  %v3334_v15 = vld [vmem:[#allocation2 + $0x28] sm:$0xff]   ;;  %v3336_v17 = vld [vmem:[#allocation2 + $0x38] sm:$0xff]  }
  0x59   :  { %3073 = vmatpush3.bf16.msra.mxu0 %v3322_v1  ;;  %v3335_v16 = vld [vmem:[#allocation2 + $0x30] sm:$0xff]   ;;  %v3337_v18 = vld [vmem:[#allocation2 + $0x40] sm:$0xff]   ;;  %v3338_v19 = vld [vmem:[#allocation2 + $0x48] sm:$0xff]  }
  0x5a   :  { %3074 = vmatprep.subr.bf16.mxu0 %v3323_v2  ;;  %v3339_v20 = vld [vmem:[#allocation2 + $0x50] sm:$0xff]   ;;  %v3340_v21 = vld [vmem:[#allocation2 + $0x58] sm:$0xff]   ;;  %v3341_v22 = vld [vmem:[#allocation2 + $0x60] sm:$0xff]  }
  0x5b   :  { %v3342_v23 = vld [vmem:[#allocation2 + $0x68] sm:$0xff]   ;;  %v3343_v24 = vld [vmem:[#allocation2 + $0x70] sm:$0xff]   ;;  %v3344_v25 = vld [vmem:[#allocation2 + $0x78] sm:$0xff]  }
  0x5c   :  { %v3345_v26 = vld [vmem:[#allocation2 + $0x80] sm:$0xff]   ;;  %v3346_v27 = vld [vmem:[#allocation2 + $0x88] sm:$0xff]   ;;  %v3347_v28 = vld [vmem:[#allocation2 + $0x90] sm:$0xff]  }
  0x5d   :  { %3075 = vmatpush3.bf16.msra.mxu0 %v3323_v2  ;;  %v3363_v29 = vld [vmem:[#allocation13 + $0x38] sm:$0xff]   ;;  %v3365_v30 = vld [vmem:[#allocation13 + $0x30] sm:$0xff]   ;;  %v3364_v32 = vld [vmem:[#allocation7 + $0x28] sm:$0xff]  }
  0x5e   :  { %3076 = vmatprep.subr.bf16.mxu0 %v3324_v3  ;;  %3150 = vmatprep.subr.bf16.mxu1 %v3363_v29  ;;  %v3348_v31 = vld [vmem:[#allocation2 + $0x98] sm:$0xff]   ;;  %v3349_v33 = vld [vmem:[#allocation2 + $0xa0] sm:$0xff]   ;;  %v3366_v34 = vld [vmem:[#allocation13 + $0x28] sm:$0xff]  }
  0x5f   :  { %3151 = vmatpush3.bf16.msra.mxu1 %v3363_v29  ;;  %v3367_v35 = vld [vmem:[#allocation7 + $0x20] sm:$0xff]   ;;  %v3368_v36 = vld [vmem:[#allocation13 + $0x20] sm:$0xff]   ;;  %v3369_v38 = vld [vmem:[#allocation7 + $0x18] sm:$0xff]  }
  0x60   :  { %3152 = vmatprep.subr.bf16.mxu1 %v3365_v30  ;;  %v3350_v37 = vld [vmem:[#allocation2 + $0xa8] sm:$0xff]   ;;  %v3351_v39 = vld [vmem:[#allocation2 + $0xb0] sm:$0xff]   ;;  %v3370_v40 = vld [vmem:[#allocation13 + $0x18] sm:$0xff]  }
  0x61   :  { %3077 = vmatpush3.bf16.msra.mxu0 %v3324_v3  ;;  %v3371_v41 = vld [vmem:[#allocation7 + $0x10] sm:$0xff]   ;;  %v3372_v42 = vld [vmem:[#allocation13 + $0x10] sm:$0xff]   ;;  %v3353_v44 = vld [vmem:[#allocation2 + $0xc0] sm:$0xff]  }
  0x62   :  { %3078 = vmatprep.subr.bf16.mxu0 %v3325_v5  ;;  %v3352_v43 = vld [vmem:[#allocation2 + $0xb8] sm:$0xff]   ;;  %v3373_v45 = vld [vmem:[#allocation7 + $0x8] sm:$0xff]   ;;  %v3374_v46 = vld [vmem:[#allocation13 + $0x8] sm:$0xff]  }
  0x63   :  { %3153 = vmatpush3.bf16.msra.mxu1 %v3365_v30  ;;  %v3375_v47 = vld [vmem:[#allocation7] sm:$0xff]   ;;  %v3376_v48 = vld [vmem:[#allocation13] sm:$0xff]   ;;  %v3355_v50 = vld [vmem:[#allocation2 + $0xd0] sm:$0xff]  }
  0x64   :  { %3154 = vmatprep.subr.bf16.mxu1 %v3366_v34  ;;  %v3354_v49 = vld [vmem:[#allocation2 + $0xc8] sm:$0xff]   ;;  %v3356_v51 = vld [vmem:[#allocation2 + $0xd8] sm:$0xff]   ;;  %v3357_v52 = vld [vmem:[#allocation2 + $0xe0] sm:$0xff]  }
  0x65   :  { %3079 = vmatpush3.bf16.msra.mxu0 %v3325_v5  ;;  %v3358_v53 = vld [vmem:[#allocation2 + $0xe8] sm:$0xff]   ;;  %v3359_v54 = vld [vmem:[#allocation2 + $0xf0] sm:$0xff]   ;;  %v3360_v55 = vld [vmem:[#allocation2 + $0xf8] sm:$0xff]  }
  0x66   :  { %3080 = vmatprep.subr.bf16.mxu0 %v3326_v6  ;;  %v3377_v56 = vld [vmem:[#allocation8] sm:$0xff]   ;;  %v3378_v57 = vld [vmem:[#allocation8 + $0x8] sm:$0xff]   ;;  %v3379_v58 = vld [vmem:[#allocation8 + $0x10] sm:$0xff]  }
  0x67   :  { %3155 = vmatpush3.bf16.msra.mxu1 %v3366_v34  ;;  %v3380_v59 = vld [vmem:[#allocation8 + $0x18] sm:$0xff]   ;;  %v3381_v60 = vld [vmem:[#allocation8 + $0x20] sm:$0xff]   ;;  %v3382_v61 = vld [vmem:[#allocation8 + $0x28] sm:$0xff]  }
  0x68   :  { %3156 = vmatprep.subr.bf16.mxu1 %v3368_v36  ;;  %v3383_v62 = vld [vmem:[#allocation8 + $0x30] sm:$0xff]   ;;  %v3384_v63 = vld [vmem:[#allocation8 + $0x38] sm:$0xff]   ;;  %v3385_v0 = vld [vmem:[#allocation8 + $0x40] sm:$0xff]  }
  0x69   :  { %3081 = vmatpush3.bf16.msra.mxu0 %v3326_v6  ;;  %v3386_v1 = vld [vmem:[#allocation8 + $0x48] sm:$0xff]   ;;  %v3387_v2 = vld [vmem:[#allocation8 + $0x50] sm:$0xff]   ;;  %v3388_v3 = vld [vmem:[#allocation8 + $0x58] sm:$0xff]  }
  0x6a   :  { %3082 = vmatprep.subr.bf16.mxu0 %v3327_v7  ;;  %v3389_v4 = vld [vmem:[#allocation8 + $0x60] sm:$0xff]   ;;  %v3390_v5 = vld [vmem:[#allocation8 + $0x68] sm:$0xff]   ;;  %v3391_v6 = vld [vmem:[#allocation8 + $0x70] sm:$0xff]  }
  0x6b   :  { %3157 = vmatpush3.bf16.msra.mxu1 %v3368_v36 }
  0x6c   :  { %3158 = vmatprep.subr.bf16.mxu1 %v3370_v40 }
  0x6d   :  { %3083 = vmatpush3.bf16.msra.mxu0 %v3327_v7  ;;  %v3392_v7 = vld [vmem:[#allocation8 + $0x78] sm:$0xff]  }
  0x6e   :  { %3084 = vmatprep.subr.bf16.mxu0 %v3328_v8 }
  0x6f   :  { %3159 = vmatpush3.bf16.msra.mxu1 %v3370_v40 }
  0x70   :  { %3160 = vmatprep.subr.bf16.mxu1 %v3372_v42 }
  0x71   :  { %3085 = vmatpush3.bf16.msra.mxu0 %v3328_v8  ;;  %v3393_v8 = vld [vmem:[#allocation8 + $0x80] sm:$0xff]  }
  0x72   :  { %3230 = vmatprep.subr.bf16.mxu0 %v3361_v13 }
  0x73   :  { %3161 = vmatpush3.bf16.msra.mxu1 %v3372_v42 }
  0x74   :  { %3087 = vmatmul.mubr.bf16.vlgmr.msra.gmra.mxu0 %v3330_v9  ;;  %3162 = vmatprep.subr.bf16.mxu1 %v3374_v46  ;;  %v3394_v9 = vld [vmem:[#allocation8 + $0x88] sm:$0xff]  }
  0x75   :  { %3090 = vmatprep.mubr.bf16.mxu0 %v3331_v10  ;;  %3231 = vmatpush3.bf16.msra.mxu0 %v3361_v13  ;;  %v3395_v10 = vld [vmem:[#allocation8 + $0x90] sm:$0xff]  }
  0x76   :  { %3232 = vmatprep.subr.bf16.mxu0 %v3362_v14 }
  0x77   :  { %3163 = vmatpush3.bf16.msra.mxu1 %v3374_v46 }
  0x78   :  { %3164 = vmatprep.subr.bf16.mxu1 %v3376_v48 }
  0x79   :  { %3233 = vmatpush3.bf16.msra.mxu0 %v3362_v14 }
  0x7a   :  { %3234 = vmatprep.subr.bf16.mxu0 %v3364_v32 }
  0x7b   :  { %3165 = vmatpush3.bf16.msra.mxu1 %v3376_v48 }
  0x7c   :  { %3091 = vmatmul.mubr.bf16.gmra.mxu0 %v3332_v11  ;;  %v3827_v11 = vld [vmem:[%s4602_s6] ss:$0 sm:$0xff] }
  0x7d   :  { %3094 = vmatprep.mubr.bf16.mxu0 %v3333_v12  ;;  %3235 = vmatpush3.bf16.msra.mxu0 %v3364_v32  ;;  %v3398_v32 = vld [vmem:[#allocation8 + $0xa8] sm:$0xff]  }
  0x7e   :  { %3236 = vmatprep.subr.bf16.mxu0 %v3367_v35 }
  0x81   :  { %3237 = vmatpush3.bf16.msra.mxu0 %v3367_v35  ;;  %v3399_v35 = vld [vmem:[#allocation8 + $0xb0] sm:$0xff]  }
  0x82   :  { %3238 = vmatprep.subr.bf16.mxu0 %v3369_v38 }
  0x84   :  { %3095 = vmatmul.mubr.bf16.gmra.mxu0 %v3334_v15 }
  0x85   :  { %3098 = vmatprep.mubr.bf16.mxu0 %v3335_v16  ;;  %3239 = vmatpush3.bf16.msra.mxu0 %v3369_v38 }
  0x86   :  { %3240 = vmatprep.subr.bf16.mxu0 %v3371_v41 }
  0x89   :  { %3241 = vmatpush3.bf16.msra.mxu0 %v3371_v41 }
  0x8a   :  { %3242 = vmatprep.subr.bf16.mxu0 %v3373_v45 }
  0x8c   :  { %3099 = vmatmul.mubr.bf16.gmra.mxu0 %v3336_v17 }
  0x8d   :  { %3102 = vmatprep.mubr.bf16.mxu0 %v3337_v18  ;;  %3243 = vmatpush3.bf16.msra.mxu0 %v3373_v45  ;;  %v3396_v18 = vld [vmem:[#allocation8 + $0x98] sm:$0xff]  }
  0x8e   :  { %3244 = vmatprep.subr.bf16.mxu0 %v3375_v47 }
  0x91   :  { %3245 = vmatpush3.bf16.msra.mxu0 %v3375_v47  ;;  %v3400_v47 = vld [vmem:[#allocation8 + $0xb8] sm:$0xff]  }
  0x94   :  { %3103 = vmatmul.mubr.bf16.gmra.mxu0 %v3338_v19 }
  0x95   :  { %3106 = vmatprep.mubr.bf16.mxu0 %v3339_v20 }
  0x9c   :  { %3107 = vmatmul.mubr.bf16.gmra.mxu0 %v3340_v21  ;;  %v3397_v21 = vld [vmem:[#allocation8 + $0xa0] sm:$0xff]  }
  0x9d   :  { %3110 = vmatprep.mubr.bf16.mxu0 %v3341_v22 }
  0xa4   :  { %3111 = vmatmul.mubr.bf16.gmra.mxu0 %v3342_v23 }
  0xa5   :  { %3114 = vmatprep.mubr.bf16.mxu0 %v3343_v24 }
  0xac   :  { %3115 = vmatmul.mubr.bf16.gmra.mxu0 %v3344_v25 }
  0xad   :  { %3118 = vmatprep.mubr.bf16.mxu0 %v3345_v26 }
  0xb4   :  { %3119 = vmatmul.mubr.bf16.gmra.mxu0 %v3346_v27 }
  0xb5   :  { %3122 = vmatprep.mubr.bf16.mxu0 %v3347_v28 }
  0xbc   :  { %3123 = vmatmul.mubr.bf16.gmra.mxu0 %v3348_v31 }
  0xbd   :  { %3126 = vmatprep.mubr.bf16.mxu0 %v3349_v33 }
  0xc4   :  { %3127 = vmatmul.mubr.bf16.gmra.mxu0 %v3350_v37 }
  0xc5   :  { %3130 = vmatprep.mubr.bf16.mxu0 %v3351_v39 }
  0xcc   :  { %3131 = vmatmul.mubr.bf16.gmra.mxu0 %v3352_v43 }
  0xcd   :  { %3134 = vmatprep.mubr.bf16.mxu0 %v3353_v44 }
  0xd4   :  { %3135 = vmatmul.mubr.bf16.gmra.mxu0 %v3354_v49 }
  0xd5   :  { %3138 = vmatprep.mubr.bf16.mxu0 %v3355_v50  ;;  %v3401_v50 = vld [vmem:[#allocation8 + $0xc0] sm:$0xff]  }
  0xdc   :  { %3139 = vmatmul.mubr.bf16.gmra.mxu0 %v3356_v51 }
  0xdd   :  { %3142 = vmatprep.mubr.bf16.mxu0 %v3357_v52 }
  0xe4   :  { %3143 = vmatmul.mubr.bf16.gmra.mxu0 %v3358_v53 }
  0xe5   :  { %3146 = vmatprep.mubr.bf16.mxu0 %v3359_v54 }
  0xec   :  { %3147 = vmatmul.mubr.bf16.gmra.mxu0 %v3360_v55 }
  0xed   :  { %3246 = vmatprep.mubr.bf16.mxu0 %v3377_v56 }
  0xf4   :  { %3247 = vmatmul.mubr.bf16.vlgmr.msra.gmra.mxu0 %v3378_v57 }
  0xf5   :  { %3250 = vmatprep.mubr.bf16.mxu0 %v3379_v58 }
  0xfc   :  { %3251 = vmatmul.mubr.bf16.gmra.mxu0 %v3380_v59 }
  0xfd   :  { %3254 = vmatprep.mubr.bf16.mxu0 %v3381_v60 }
 0x104   :  { %3255 = vmatmul.mubr.bf16.gmra.mxu0 %v3382_v61 }
 0x105   :  { %3258 = vmatprep.mubr.bf16.mxu0 %v3383_v62 }
 0x10c   :  { %3259 = vmatmul.mubr.bf16.gmra.mxu0 %v3384_v63 }
 0x10d   :  { %3262 = vmatprep.mubr.bf16.mxu0 %v3385_v0 }
 0x114   :  { %3263 = vmatmul.mubr.bf16.gmra.mxu0 %v3386_v1 }
 0x115   :  { %3266 = vmatprep.mubr.bf16.mxu0 %v3387_v2 }
 0x11c   :  { %3267 = vmatmul.mubr.bf16.gmra.mxu0 %v3388_v3 }
 0x11d   :  { %3270 = vmatprep.mubr.bf16.mxu0 %v3389_v4 }
 0x124   :  { %3271 = vmatmul.mubr.bf16.gmra.mxu0 %v3390_v5 }
 0x125   :  { %3274 = vmatprep.mubr.bf16.mxu0 %v3391_v6 }
 0x12c   :  { %3275 = vmatmul.mubr.bf16.gmra.mxu0 %v3392_v7 }
 0x12d   :  { %3278 = vmatprep.mubr.bf16.mxu0 %v3393_v8 }
 0x134   :  { %v3088_v12 = vpop.f32.mrf.mxu0  ;;  %3279 = vmatmul.mubr.bf16.gmra.mxu0 %v3394_v9 }
 0x135   :  { %v3830_v13 = vadd.f32 %v3088_v12, %v3827_v11  ;;  %3282 = vmatprep.mubr.bf16.mxu0 %v3395_v10  ;;  %v3402_v12 = vld [vmem:[#allocation8 + $0xc8] sm:$0xff]  }
 0x136   :  { %v488_v14 = vpop.f32.mrf.mxu0 }
 0x137   :  { %v809_v15 = vmul.f32 0.70710677, %v3830_v13  ;;  %v3834_v16 = vadd.f32 %v3827_v11, %v488_v14  ;;  %v745_v4 = vmul.f32 0.5, %v3830_v13 }
 0x138   :  { %v3089_v17 = vpop.f32.mrf.mxu0 }
 0x139   :  { %v807_v19 = vmul.f32 0.70710677, %v3834_v16  ;;  %v500_v20 = vadd.f32 %v3089_v17, %v3827_v11  ;;  %3409 = verf.f32 %v809_v15  ;;  %v743_v63 = vmul.f32 0.5, %v3834_v16 }
 0x13a   :  { %v491_v22 = vpop.f32.mrf.mxu0 }
 0x13b   :  { %v810_v23 = vmul.f32 0.70710677, %v500_v20  ;;  %v492_v24 = vadd.f32 %v3827_v11, %v491_v22  ;;  %3411 = verf.f32 %v807_v19  ;;  %v746_v61 = vmul.f32 0.5, %v500_v20 }
 0x13c   :  { %v3092_v25 = vpop.f32.mrf.mxu0  ;;  %3283 = vmatmul.mubr.bf16.gmra.mxu0 %v3396_v18  ;;  %v3403_v18 = vld [vmem:[#allocation8 + $0xd0] sm:$0xff]  }
 0x13d   :  { %3413 = verf.f32 %v810_v23  ;;  %v808_v26 = vmul.f32 0.70710677, %v492_v24  ;;  %v3840_v27 = vadd.f32 %v3092_v25, %v3827_v11  ;;  %3286 = vmatprep.mubr.bf16.mxu0 %v3397_v21  ;;  %v744_v0 = vmul.f32 0.5, %v492_v24 }
 0x13e   :  { %v504_v28 = vpop.f32.mrf.mxu0 }
 0x13f   :  { %3415 = verf.f32 %v808_v26  ;;  %v813_v29 = vmul.f32 0.70710677, %v3840_v27  ;;  %v3844_v30 = vadd.f32 %v3827_v11, %v504_v28 }
 0x140   :  { %v3093_v31 = vpop.f32.mrf.mxu0 }
 0x141   :  { %v811_v33 = vmul.f32 0.70710677, %v3844_v30  ;;  %v3848_v34 = vadd.f32 %v3093_v31, %v3827_v11  ;;  %3417 = verf.f32 %v813_v29 }
 0x142   :  { %v507_v36 = vpop.f32.mrf.mxu0 }
 0x143   :  { %v814_v37 = vmul.f32 0.70710677, %v3848_v34  ;;  %v3852_v38 = vadd.f32 %v3827_v11, %v507_v36  ;;  %3419 = verf.f32 %v811_v33  ;;  %v750_v28 = vmul.f32 0.5, %v3848_v34 }
 0x144   :  { %v3096_v39 = vpop.f32.mrf.mxu0  ;;  %3287 = vmatmul.mubr.bf16.gmra.mxu0 %v3398_v32 }
 0x145   :  { %3421 = verf.f32 %v814_v37  ;;  %v812_v40 = vmul.f32 0.70710677, %v3852_v38  ;;  %v3856_v41 = vadd.f32 %v3096_v39, %v3827_v11  ;;  %3290 = vmatprep.mubr.bf16.mxu0 %v3399_v35  ;;  %v748_v29 = vmul.f32 0.5, %v3852_v38 }
 0x146   :  { %v520_v42 = vpop.f32.mrf.mxu0  ;;  %v3410_v44 = vpop.eup %3409  ;;  %v749_v37 = vmul.f32 0.5, %v3840_v27  ;;  %v747_v39 = vmul.f32 0.5, %v3844_v30 }
 0x147   :  { %3423 = verf.f32 %v812_v40  ;;  %v817_v43 = vmul.f32 0.70710677, %v3856_v41  ;;  %v3860_v45 = vadd.f32 %v3827_v11, %v520_v42  ;;  %v937_v60 = vadd.f32 1.0, %v3410_v44 }
 0x148   :  { %v3097_v46 = vpop.f32.mrf.mxu0  ;;  %v3412_v48 = vpop.eup %3411 }
 0x149   :  { %v3863_v49 = vadd.f32 %v3097_v46, %v3827_v11  ;;  %v815_v52 = vmul.f32 0.70710677, %v3860_v45  ;;  %3425 = verf.f32 %v817_v43  ;;  %v935_v59 = vadd.f32 1.0, %v3412_v48 }
 0x14a   :  { %v3414_v51 = vpop.eup %3413  ;;  %v523_v53 = vpop.f32.mrf.mxu0  ;;  %v1001_v15 = vmul.f32 %v937_v60, %v745_v4 }
 0x14b   :  { %v938_v54 = vadd.f32 1.0, %v3414_v51  ;;  %v818_v55 = vmul.f32 0.70710677, %v3863_v49  ;;  %v3868_v56 = vadd.f32 %v3827_v11, %v523_v53  ;;  %3427 = verf.f32 %v815_v52  ;;  %v3405_v53 = vld [vmem:[#allocation8 + $0xe0] sm:$0xff]  }
 0x14c   :  { %v3416_v57 = vpop.eup %3415  ;;  %v3100_v58 = vpop.f32.mrf.mxu0  ;;  %3291 = vmatmul.mubr.bf16.gmra.mxu0 %v3400_v47  ;;  %v999_v9 = vmul.f32 %v935_v59, %v743_v63 }
 0x14d   :  { %3429 = verf.f32 %v818_v55  ;;  %v816_v62 = vmul.f32 0.70710677, %v3868_v56  ;;  %3294 = vmatprep.mubr.bf16.mxu0 %v3401_v50  ;;  %v3873_v1 = vadd.f32 %v3100_v58, %v3827_v11  ;;  %v936_v3 = vadd.f32 1.0, %v3416_v57  ;;  %v3404_v50 = vld [vmem:[#allocation8 + $0xd8] sm:$0xff]  }
 0x14e   :  { %v536_v2 = vpop.f32.mrf.mxu0  ;;  %v1002_v5 = vmul.f32 %v938_v54, %v746_v61  ;;  %v3418_v7 = vpop.eup %3417  ;;  %v754_v55 = vmul.f32 0.5, %v3863_v49 }
 0x14f   :  { %3431 = verf.f32 %v816_v62  ;;  %v3877_v6 = vadd.f32 %v3827_v11, %v536_v2  ;;  %v1000_v10 = vmul.f32 %v936_v3, %v744_v0  ;;  %v821_v16 = vmul.f32 0.70710677, %v3873_v1 }
 0x150   :  { %v3101_v8 = vpop.f32.mrf.mxu0  ;;  %v3420_v14 = vpop.eup %3419  ;;  %v1064_v24 = vpack.c.bf16 %v1002_v5, %v1001_v15  ;;  %v941_v33 = vadd.f32 1.0, %v3418_v7  ;;  %v752_v0 = vmul.f32 0.5, %v3868_v56  ;;  %v751_v7 = vmul.f32 0.5, %v3860_v45 }
 0x151   :  { %v819_v17 = vmul.f32 0.70710677, %v3877_v6  ;;  %v3882_v13 = vadd.f32 %v3101_v8, %v3827_v11  ;;  %v1063_v21 = vpack.c.bf16 %v1000_v10, %v999_v9  ;;  %v939_v26 = vadd.f32 1.0, %v3420_v14 }
 0x152   :  { %v3422_v19 = vpop.eup %3421  ;;  %v539_v20 = vpop.f32.mrf.mxu0  ;;  %v1005_v51 = vmul.f32 %v941_v33, %v749_v37  ;;  %v753_v9 = vmul.f32 0.5, %v3856_v41 }
 0x153   :  { %v942_v22 = vadd.f32 1.0, %v3422_v19  ;;  %3433 = verf.f32 %v819_v17  ;;  %v3885_v23 = vadd.f32 %v3827_v11, %v539_v20  ;;  %v822_v31 = vmul.f32 0.70710677, %v3882_v13  ;;  %3166 = vmatprep.mubr.bf16.mxu1 %v1063_v21  ;;  %v3406_v19 = vld [vmem:[#allocation8 + $0xe8] sm:$0xff]   ;;  %v3407_v21 = vld [vmem:[#allocation8 + $0xf0] sm:$0xff]  }
 0x154   :  { %v3424_v25 = vpop.eup %3423  ;;  %v3104_v32 = vpop.f32.mrf.mxu0  ;;  %3295 = vmatmul.mubr.bf16.gmra.mxu0 %v3402_v12  ;;  %3435 = verf.f32 %v821_v16  ;;  %3167 = vmatmul.mubr.bf16.vlgmr.msra.gmra.mxu1 %v1064_v24  ;;  %v1003_v46 = vmul.f32 %v939_v26, %v747_v39  ;;  %v755_v24 = vmul.f32 0.5, %v3877_v6 }
 0x155   :  { %v940_v35 = vadd.f32 1.0, %v3424_v25  ;;  %v820_v36 = vmul.f32 0.70710677, %v3885_v23  ;;  %3298 = vmatprep.mubr.bf16.mxu0 %v3403_v18  ;;  %3437 = verf.f32 %v822_v31  ;;  %v3894_v34 = vadd.f32 %v3104_v32, %v3827_v11 }
 0x156   :  { %v552_v38 = vpop.f32.mrf.mxu0  ;;  %v1006_v40 = vmul.f32 %v942_v22, %v750_v28  ;;  %v3426_v44 = vpop.eup %3425  ;;  %v758_v31 = vmul.f32 0.5, %v3882_v13  ;;  %v756_v37 = vmul.f32 0.5, %v3885_v23 }
 0x157   :  { %v1004_v42 = vmul.f32 %v940_v35, %v748_v29  ;;  %3439 = verf.f32 %v820_v36  ;;  %v3897_v43 = vadd.f32 %v3827_v11, %v552_v38  ;;  %v825_v47 = vmul.f32 0.70710677, %v3894_v34 }
 0x158   :  { %v3105_v48 = vpop.f32.mrf.mxu0  ;;  %v3428_v27 = vpop.eup %3427  ;;  %v1066_v61 = vpack.c.bf16 %v1006_v40, %v1005_v51  ;;  %v945_v4 = vadd.f32 1.0, %v3426_v44  ;;  %v757_v44 = vmul.f32 0.5, %v3873_v1 }
 0x159   :  { %v823_v30 = vmul.f32 0.70710677, %v3897_v43  ;;  %v3902_v52 = vadd.f32 %v3105_v48, %v3827_v11  ;;  %v1065_v58 = vpack.c.bf16 %v1004_v42, %v1003_v46  ;;  %3441 = verf.f32 %v825_v47 }
 0x15a   :  { %v3430_v54 = vpop.eup %3429  ;;  %v555_v57 = vpop.f32.mrf.mxu0  ;;  %v943_v63 = vadd.f32 1.0, %v3428_v27  ;;  %v1009_v20 = vmul.f32 %v945_v4, %v753_v9  ;;  %v759_v9 = vmul.f32 0.5, %v3897_v43 }
 0x15b   :  { %v946_v59 = vadd.f32 1.0, %v3430_v54  ;;  %v826_v60 = vmul.f32 0.70710677, %v3902_v52  ;;  %3443 = verf.f32 %v823_v30  ;;  %v3908_v2 = vadd.f32 %v3827_v11, %v555_v57  ;;  %3170 = vmatprep.mubr.bf16.mxu1 %v1065_v58 }
 0x15c   :  { %v3432_v62 = vpop.eup %3431  ;;  %v3108_v3 = vpop.f32.mrf.mxu0  ;;  %3299 = vmatmul.mubr.bf16.gmra.mxu0 %v3404_v50  ;;  %3171 = vmatmul.mubr.bf16.gmra.mxu1 %v1066_v61  ;;  %v1007_v16 = vmul.f32 %v943_v63, %v751_v7 }
 0x15d   :  { %v944_v49 = vadd.f32 1.0, %v3432_v62  ;;  %3445 = verf.f32 %v826_v60  ;;  %v3911_v5 = vadd.f32 %v3108_v3, %v3827_v11  ;;  %3302 = vmatprep.mubr.bf16.mxu0 %v3405_v53  ;;  %v824_v8 = vmul.f32 0.70710677, %v3908_v2  ;;  %v3408_v53 = vld [vmem:[#allocation8 + $0xf8] sm:$0xff]  }
 0x15e   :  { %v568_v56 = vpop.f32.mrf.mxu0  ;;  %v1010_v10 = vmul.f32 %v946_v59, %v754_v55 }
 0x15f   :  { %v1008_v12 = vmul.f32 %v944_v49, %v752_v0  ;;  %v3917_v14 = vadd.f32 %v3827_v11, %v568_v56  ;;  %3447 = verf.f32 %v824_v8  ;;  %v829_v17 = vmul.f32 0.70710677, %v3911_v5 }
 0x160   :  { %v3434_v15 = vpop.eup %3433  ;;  %v3109_v18 = vpop.f32.mrf.mxu0  ;;  %v1068_v33 = vpack.c.bf16 %v1010_v10, %v1009_v20  ;;  %v762_v8 = vmul.f32 0.5, %v3902_v52  ;;  %v760_v10 = vmul.f32 0.5, %v3908_v2 }
 0x161   :  { %v827_v45 = vmul.f32 0.70710677, %v3917_v14  ;;  %v3436_v22 = vpop.eup %3435  ;;  %v947_v41 = vadd.f32 1.0, %v3434_v15  ;;  %v3923_v25 = vadd.f32 %v3109_v18, %v3827_v11  ;;  %v1067_v28 = vpack.c.bf16 %v1008_v12, %v1007_v16 }
 0x162   :  { %v571_v26 = vpop.f32.mrf.mxu0  ;;  %v3438_v29 = vpop.eup %3437  ;;  %v949_v38 = vadd.f32 1.0, %v3436_v22  ;;  %v763_v43 = vmul.f32 0.5, %v3917_v14 }
 0x163   :  { %3449 = verf.f32 %v827_v45  ;;  %v3927_v32 = vadd.f32 %v3827_v11, %v571_v26  ;;  %v950_v36 = vadd.f32 1.0, %v3438_v29  ;;  %v830_v6 = vmul.f32 0.70710677, %v3923_v25  ;;  %3174 = vmatprep.mubr.bf16.mxu1 %v1067_v28 }
 0x164   :  { %v3440_v35 = vpop.eup %3439  ;;  %3451 = verf.f32 %v829_v17  ;;  %v3112_v39 = vpop.f32.mrf.mxu0  ;;  %3303 = vmatmul.mubr.bf16.gmra.mxu0 %v3406_v19  ;;  %3175 = vmatmul.mubr.bf16.gmra.mxu1 %v1068_v33  ;;  %v1011_v46 = vmul.f32 %v947_v41, %v755_v24  ;;  %v1013_v55 = vmul.f32 %v949_v38, %v757_v44  ;;  %v761_v17 = vmul.f32 0.5, %v3894_v34 }
 0x165   :  { %v948_v40 = vadd.f32 1.0, %v3440_v35  ;;  %v828_v42 = vmul.f32 0.70710677, %v3927_v32  ;;  %v3933_v13 = vadd.f32 %v3112_v39, %v3827_v11  ;;  %3306 = vmatprep.mubr.bf16.mxu0 %v3407_v21  ;;  %3453 = verf.f32 %v830_v6 }
 0x166   :  { %v584_v23 = vpop.f32.mrf.mxu0  ;;  %v1014_v47 = vmul.f32 %v950_v36, %v758_v31  ;;  %v3442_v27 = vpop.eup %3441  ;;  %v766_v41 = vmul.f32 0.5, %v3923_v25  ;;  %v764_v35 = vmul.f32 0.5, %v3927_v32  ;;  %v765_v32 = vmul.f32 0.5, %v3911_v5 }
 0x167   :  { %v1012_v48 = vmul.f32 %v948_v40, %v756_v37  ;;  %3455 = verf.f32 %v828_v42  ;;  %v833_v50 = vmul.f32 0.70710677, %v3933_v13  ;;  %v3938_v51 = vadd.f32 %v3827_v11, %v584_v23 }
 0x168   :  { %v3113_v30 = vpop.f32.mrf.mxu0  ;;  %v3444_v54 = vpop.eup %3443  ;;  %v1070_v63 = vpack.c.bf16 %v1014_v47, %v1013_v55  ;;  %v953_v7 = vadd.f32 1.0, %v3442_v27 }
 0x169   :  { %v3941_v57 = vadd.f32 %v3113_v30, %v3827_v11  ;;  %v1069_v1 = vpack.c.bf16 %v1012_v48, %v1011_v46  ;;  %v831_v59 = vmul.f32 0.70710677, %v3938_v51  ;;  %3457 = verf.f32 %v833_v50 }
 0x16a   :  { %v3446_v58 = vpop.eup %3445  ;;  %v587_v60 = vpop.f32.mrf.mxu0  ;;  %v951_v0 = vadd.f32 1.0, %v3444_v54  ;;  %v1017_v24 = vmul.f32 %v953_v7, %v761_v17 }
 0x16b   :  { %v954_v61 = vadd.f32 1.0, %v3446_v58  ;;  %v834_v62 = vmul.f32 0.70710677, %v3941_v57  ;;  %3178 = vmatprep.mubr.bf16.mxu1 %v1069_v1  ;;  %3459 = verf.f32 %v831_v59  ;;  %v3946_v3 = vadd.f32 %v3827_v11, %v587_v60 }
 0x16c   :  { %v3116_v4 = vpop.f32.mrf.mxu0  ;;  %3307 = vmatmul.mubr.bf16.gmra.mxu0 %v3408_v53  ;;  %v3448_v49 = vpop.eup %3447  ;;  %3179 = vmatmul.mubr.bf16.gmra.mxu1 %v1070_v63  ;;  %v1015_v20 = vmul.f32 %v951_v0, %v759_v9  ;;  %v770_v9 = vmul.f32 0.5, %v3941_v57 }
 0x16d   :  { %3461 = verf.f32 %v834_v62  ;;  %v3950_v56 = vadd.f32 %v3116_v4, %v3827_v11  ;;  %v952_v12 = vadd.f32 1.0, %v3448_v49  ;;  %v832_v15 = vmul.f32 0.70710677, %v3946_v3 }
 0x16e   :  { %v600_v16 = vpop.f32.mrf.mxu0  ;;  %v1018_v18 = vmul.f32 %v954_v61, %v762_v8 }
 0x16f   :  { %v3957_v19 = vadd.f32 %v3827_v11, %v600_v16  ;;  %v1016_v45 = vmul.f32 %v952_v12, %v760_v10  ;;  %3463 = verf.f32 %v832_v15  ;;  %v837_v2 = vmul.f32 0.70710677, %v3950_v56 }
 0x170   :  { %v3450_v52 = vpop.eup %3449  ;;  %v3117_v21 = vpop.f32.mrf.mxu0  ;;  %v1072_v37 = vpack.c.bf16 %v1018_v18, %v1017_v24  ;;  %v767_v12 = vmul.f32 0.5, %v3938_v51  ;;  %v768_v15 = vmul.f32 0.5, %v3946_v3 }
 0x171   :  { %v3452_v22 = vpop.eup %3451  ;;  %v835_v26 = vmul.f32 0.70710677, %v3957_v19  ;;  %v3964_v34 = vadd.f32 %v3117_v21, %v3827_v11  ;;  %v1071_v29 = vpack.c.bf16 %v1016_v45, %v1015_v20  ;;  %v955_v33 = vadd.f32 1.0, %v3450_v52 }
 0x172   :  { %v603_v28 = vpop.f32.mrf.mxu0  ;;  %v3454_v31 = vpop.eup %3453  ;;  %v957_v6 = vadd.f32 1.0, %v3452_v22  ;;  %v769_v52 = vmul.f32 0.5, %v3933_v13  ;;  %v771_v13 = vmul.f32 0.5, %v3957_v19 }
 0x173   :  { %v3968_v36 = vadd.f32 %v3827_v11, %v603_v28  ;;  %v958_v39 = vadd.f32 1.0, %v3454_v31  ;;  %3465 = verf.f32 %v835_v26  ;;  %v838_v25 = vmul.f32 0.70710677, %v3964_v34  ;;  %3182 = vmatprep.mubr.bf16.mxu1 %v1071_v29 }
 0x174   :  { %v3456_v14 = vpop.eup %3455  ;;  %v3120_v38 = vpop.f32.mrf.mxu0  ;;  %3467 = verf.f32 %v837_v2  ;;  %3183 = vmatmul.mubr.bf16.gmra.mxu1 %v1072_v37  ;;  %v1019_v47 = vmul.f32 %v955_v33, %v763_v43  ;;  %v1021_v27 = vmul.f32 %v957_v6, %v765_v32  ;;  %v774_v6 = vmul.f32 0.5, %v3964_v34 }
 0x175   :  { %v956_v40 = vadd.f32 1.0, %v3456_v14  ;;  %v836_v42 = vmul.f32 0.70710677, %v3968_v36  ;;  %v3973_v44 = vadd.f32 %v3120_v38, %v3827_v11  ;;  %v1022_v46 = vmul.f32 %v958_v39, %v766_v41 }
 0x176   :  { %3469 = verf.f32 %v838_v25  ;;  %v616_v23 = vpop.f32.mrf.mxu0  ;;  %v3458_v50 = vpop.eup %3457  ;;  %v772_v25 = vmul.f32 0.5, %v3968_v36  ;;  %v773_v32 = vmul.f32 0.5, %v3950_v56 }
 0x177   :  { %v1020_v48 = vmul.f32 %v956_v40, %v764_v35  ;;  %3471 = verf.f32 %v836_v42  ;;  %v841_v30 = vmul.f32 0.70710677, %v3973_v44  ;;  %v3978_v53 = vadd.f32 %v3827_v11, %v616_v23 }
 0x178   :  { %v3121_v54 = vpop.f32.mrf.mxu0  ;;  %v3460_v55 = vpop.eup %3459  ;;  %v1074_v61 = vpack.c.bf16 %v1022_v46, %v1021_v27  ;;  %v961_v8 = vadd.f32 1.0, %v3458_v50 }
 0x179   :  { %v3981_v1 = vadd.f32 %v3121_v54, %v3827_v11  ;;  %v1073_v58 = vpack.c.bf16 %v1020_v48, %v1019_v47  ;;  %v839_v59 = vmul.f32 0.70710677, %v3978_v53  ;;  %3473 = verf.f32 %v841_v30 }
 0x17a   :  { %v3462_v5 = vpop.eup %3461  ;;  %v619_v60 = vpop.f32.mrf.mxu0  ;;  %v959_v4 = vadd.f32 1.0, %v3460_v55  ;;  %v1025_v43 = vmul.f32 %v961_v8, %v769_v52 }
 0x17b   :  { %v962_v62 = vadd.f32 1.0, %v3462_v5  ;;  %v842_v63 = vmul.f32 0.70710677, %v3981_v1  ;;  %v3986_v0 = vadd.f32 %v3827_v11, %v619_v60  ;;  %3186 = vmatprep.mubr.bf16.mxu1 %v1073_v58  ;;  %3475 = verf.f32 %v839_v59 }
 0x17c   :  { %v3124_v49 = vpop.f32.mrf.mxu0  ;;  %v3464_v7 = vpop.eup %3463  ;;  %3187 = vmatmul.mubr.bf16.gmra.mxu1 %v1074_v61  ;;  %v1023_v57 = vmul.f32 %v959_v4, %v767_v12  ;;  %v778_v60 = vmul.f32 0.5, %v3981_v1 }
 0x17d   :  { %3477 = verf.f32 %v842_v63  ;;  %v840_v10 = vmul.f32 0.70710677, %v3986_v0  ;;  %v960_v16 = vadd.f32 1.0, %v3464_v7  ;;  %v3993_v17 = vadd.f32 %v3124_v49, %v3827_v11 }
 0x17e   :  { %v632_v18 = vpop.f32.mrf.mxu0  ;;  %v1026_v20 = vmul.f32 %v962_v62, %v770_v9  ;;  %v776_v8 = vmul.f32 0.5, %v3986_v0 }
 0x17f   :  { %3479 = verf.f32 %v840_v10  ;;  %v3997_v45 = vadd.f32 %v3827_v11, %v632_v18  ;;  %v1024_v21 = vmul.f32 %v960_v16, %v768_v15  ;;  %v845_v22 = vmul.f32 0.70710677, %v3993_v17 }
 0x180   :  { %v3125_v24 = vpop.f32.mrf.mxu0  ;;  %v3466_v51 = vpop.eup %3465  ;;  %v1076_v37 = vpack.c.bf16 %v1026_v20, %v1025_v43  ;;  %v775_v16 = vmul.f32 0.5, %v3978_v53  ;;  %v777_v20 = vmul.f32 0.5, %v3973_v44 }
 0x181   :  { %v843_v3 = vmul.f32 0.70710677, %v3997_v45  ;;  %v4002_v2 = vadd.f32 %v3125_v24, %v3827_v11  ;;  %v3468_v41 = vpop.eup %3467  ;;  %v963_v26 = vadd.f32 1.0, %v3466_v51  ;;  %v1075_v29 = vpack.c.bf16 %v1024_v21, %v1023_v57 }
 0x182   :  { %v635_v28 = vpop.f32.mrf.mxu0  ;;  %3481 = verf.f32 %v845_v22  ;;  %v965_v38 = vadd.f32 1.0, %v3468_v41 }
 0x183   :  { %v3470_v31 = vpop.eup %3469  ;;  %v846_v33 = vmul.f32 0.70710677, %v4002_v2  ;;  %v4007_v35 = vadd.f32 %v3827_v11, %v635_v28  ;;  %3483 = verf.f32 %v843_v3  ;;  %3190 = vmatprep.mubr.bf16.mxu1 %v1075_v29  ;;  %v1027_v46 = vmul.f32 %v963_v26, %v771_v13 }
 0x184   :  { %v3472_v14 = vpop.eup %3471  ;;  %v966_v39 = vadd.f32 1.0, %v3470_v31  ;;  %v3128_v19 = vpop.f32.mrf.mxu0  ;;  %3191 = vmatmul.mubr.bf16.gmra.mxu1 %v1076_v37  ;;  %v1029_v55 = vmul.f32 %v965_v38, %v773_v32  ;;  %v781_v32 = vmul.f32 0.5, %v3993_v17 }
 0x185   :  { %v964_v40 = vadd.f32 1.0, %v3472_v14  ;;  %3485 = verf.f32 %v846_v33  ;;  %v844_v42 = vmul.f32 0.70710677, %v4007_v35  ;;  %v4014_v23 = vadd.f32 %v3128_v19, %v3827_v11 }
 0x186   :  { %v648_v47 = vpop.f32.mrf.mxu0  ;;  %v1030_v34 = vmul.f32 %v966_v39, %v774_v6  ;;  %v3474_v50 = vpop.eup %3473  ;;  %v782_v6 = vmul.f32 0.5, %v4002_v2  ;;  %v780_v38 = vmul.f32 0.5, %v4007_v35 }
 0x187   :  { %v1028_v48 = vmul.f32 %v964_v40, %v772_v25  ;;  %3487 = verf.f32 %v844_v42  ;;  %v4017_v36 = vadd.f32 %v3827_v11, %v648_v47  ;;  %v849_v27 = vmul.f32 0.70710677, %v4014_v23 }
 0x188   :  { %v3129_v30 = vpop.f32.mrf.mxu0  ;;  %v3476_v54 = vpop.eup %3475  ;;  %v1078_v4 = vpack.c.bf16 %v1030_v34, %v1029_v55  ;;  %v969_v12 = vadd.f32 1.0, %v3474_v50 }
 0x189   :  { %v847_v58 = vmul.f32 0.70710677, %v4017_v36  ;;  %v4022_v56 = vadd.f32 %v3129_v30, %v3827_v11  ;;  %v1077_v5 = vpack.c.bf16 %v1028_v48, %v1027_v46  ;;  %3489 = verf.f32 %v849_v27 }
 0x18a   :  { %v3478_v59 = vpop.eup %3477  ;;  %v651_v61 = vpop.f32.mrf.mxu0  ;;  %v967_v7 = vadd.f32 1.0, %v3476_v54  ;;  %v1033_v41 = vmul.f32 %v969_v12, %v777_v20  ;;  %v779_v46 = vmul.f32 0.5, %v3997_v45  ;;  %v783_v12 = vmul.f32 0.5, %v4017_v36 }
 0x18b   :  { %v970_v62 = vadd.f32 1.0, %v3478_v59  ;;  %v850_v63 = vmul.f32 0.70710677, %v4022_v56  ;;  %3194 = vmatprep.mubr.bf16.mxu1 %v1077_v5  ;;  %3491 = verf.f32 %v847_v58  ;;  %v4028_v9 = vadd.f32 %v3827_v11, %v651_v61 }
 0x18c   :  { %v3480_v49 = vpop.eup %3479  ;;  %v3132_v10 = vpop.f32.mrf.mxu0  ;;  %3195 = vmatmul.mubr.bf16.gmra.mxu1 %v1078_v4  ;;  %v1031_v24 = vmul.f32 %v967_v7, %v775_v16 }
 0x18d   :  { %v968_v15 = vadd.f32 1.0, %v3480_v49  ;;  %3493 = verf.f32 %v850_v63  ;;  %v4031_v1 = vadd.f32 %v3132_v10, %v3827_v11  ;;  %v848_v18 = vmul.f32 0.70710677, %v4028_v9 }
 0x18e   :  { %v664_v52 = vpop.f32.mrf.mxu0  ;;  %v1034_v0 = vmul.f32 %v970_v62, %v778_v60 }
 0x18f   :  { %v1032_v57 = vmul.f32 %v968_v15, %v776_v8  ;;  %v4037_v21 = vadd.f32 %v3827_v11, %v664_v52  ;;  %v3482_v22 = vpop.eup %3481  ;;  %3495 = verf.f32 %v848_v18  ;;  %v853_v51 = vmul.f32 0.70710677, %v4031_v1 }
 0x190   :  { %v3133_v43 = vpop.f32.mrf.mxu0  ;;  %v3484_v3 = vpop.eup %3483  ;;  %v1080_v33 = vpack.c.bf16 %v1034_v0, %v1033_v41  ;;  %v973_v19 = vadd.f32 1.0, %v3482_v22  ;;  %v786_v15 = vmul.f32 0.5, %v4022_v56  ;;  %v784_v18 = vmul.f32 0.5, %v4028_v9 }
 0x191   :  { %v851_v53 = vmul.f32 0.70710677, %v4037_v21  ;;  %v4042_v26 = vadd.f32 %v3133_v43, %v3827_v11  ;;  %v1079_v28 = vpack.c.bf16 %v1032_v57, %v1031_v24  ;;  %v971_v14 = vadd.f32 1.0, %v3484_v3 }
 0x192   :  { %v3486_v13 = vpop.eup %3485  ;;  %v667_v44 = vpop.f32.mrf.mxu0  ;;  %v1037_v17 = vmul.f32 %v973_v19, %v781_v32  ;;  %v785_v57 = vmul.f32 0.5, %v4014_v23  ;;  %v787_v9 = vmul.f32 0.5, %v4037_v21 }
 0x193   :  { %v974_v29 = vadd.f32 1.0, %v3486_v13  ;;  %3497 = verf.f32 %v851_v53  ;;  %v4045_v31 = vadd.f32 %v3827_v11, %v667_v44  ;;  %v854_v39 = vmul.f32 0.70710677, %v4042_v26  ;;  %3198 = vmatprep.mubr.bf16.mxu1 %v1079_v28 }
 0x194   :  { %v3488_v37 = vpop.eup %3487  ;;  %3499 = verf.f32 %v853_v51  ;;  %v3136_v25 = vpop.f32.mrf.mxu0  ;;  %3199 = vmatmul.mubr.bf16.gmra.mxu1 %v1080_v33  ;;  %v1035_v27 = vmul.f32 %v971_v14, %v779_v46 }
 0x195   :  { %v972_v40 = vadd.f32 1.0, %v3488_v37  ;;  %v852_v42 = vmul.f32 0.70710677, %v4045_v31  ;;  %3501 = verf.f32 %v854_v39  ;;  %v4054_v47 = vadd.f32 %v3136_v25, %v3827_v11 }
 0x196   :  { %v680_v2 = vpop.f32.mrf.mxu0  ;;  %v1038_v34 = vmul.f32 %v974_v29, %v782_v6  ;;  %v3490_v35 = vpop.eup %3489  ;;  %v790_v37 = vmul.f32 0.5, %v4042_v26  ;;  %v788_v14 = vmul.f32 0.5, %v4045_v31  ;;  %v789_v31 = vmul.f32 0.5, %v4031_v1 }
 0x197   :  { %v1036_v48 = vmul.f32 %v972_v40, %v780_v38  ;;  %3503 = verf.f32 %v852_v42  ;;  %v4057_v50 = vadd.f32 %v3827_v11, %v680_v2  ;;  %v857_v30 = vmul.f32 0.70710677, %v4054_v47 }
 0x198   :  { %v3137_v54 = vpop.f32.mrf.mxu0  ;;  %v3492_v55 = vpop.eup %3491  ;;  %v1082_v62 = vpack.c.bf16 %v1038_v34, %v1037_v17  ;;  %v977_v10 = vadd.f32 1.0, %v3490_v35 }
 0x199   :  { %v855_v45 = vmul.f32 0.70710677, %v4057_v50  ;;  %v4062_v58 = vadd.f32 %v3137_v54, %v3827_v11  ;;  %v1081_v60 = vpack.c.bf16 %v1036_v48, %v1035_v27  ;;  %3505 = verf.f32 %v857_v30 }
 0x19a   :  { %v3494_v5 = vpop.eup %3493  ;;  %v683_v59 = vpop.f32.mrf.mxu0  ;;  %v975_v63 = vadd.f32 1.0, %v3492_v55  ;;  %v1041_v41 = vmul.f32 %v977_v10, %v785_v57 }
 0x19b   :  { %v978_v61 = vadd.f32 1.0, %v3494_v5  ;;  %3507 = verf.f32 %v855_v45  ;;  %v858_v4 = vmul.f32 0.70710677, %v4062_v58  ;;  %v4066_v49 = vadd.f32 %v3827_v11, %v683_v59  ;;  %3202 = vmatprep.mubr.bf16.mxu1 %v1081_v60 }
 0x19c   :  { %v3140_v7 = vpop.f32.mrf.mxu0  ;;  %v3496_v8 = vpop.eup %3495  ;;  %3203 = vmatmul.mubr.bf16.gmra.mxu1 %v1082_v62  ;;  %v1039_v51 = vmul.f32 %v975_v63, %v783_v12  ;;  %v794_v1 = vmul.f32 0.5, %v4062_v58  ;;  %v793_v58 = vmul.f32 0.5, %v4054_v47 }
 0x19d   :  { %v4071_v16 = vadd.f32 %v3140_v7, %v3827_v11  ;;  %v976_v52 = vadd.f32 1.0, %v3496_v8  ;;  %3509 = verf.f32 %v858_v4  ;;  %v856_v20 = vmul.f32 0.70710677, %v4066_v49 }
 0x19e   :  { %v696_v0 = vpop.f32.mrf.mxu0  ;;  %v1042_v22 = vmul.f32 %v978_v61, %v786_v15  ;;  %v792_v57 = vmul.f32 0.5, %v4066_v49 }
 0x19f   :  { %v4077_v24 = vadd.f32 %v3827_v11, %v696_v0  ;;  %v1040_v56 = vmul.f32 %v976_v52, %v784_v18  ;;  %3511 = verf.f32 %v856_v20  ;;  %v861_v53 = vmul.f32 0.70710677, %v4071_v16  ;;  %v3553_v52 = vld [vmem:[%s4602_s6] ss:$0 sm:$0xff] }
 0x1a0   :  { %v3498_v36 = vpop.eup %3497  ;;  %v3141_v43 = vpop.f32.mrf.mxu0  ;;  %v1084_v39 = vpack.c.bf16 %v1042_v22, %v1041_v41 }
 0x1a1   :  { %v3500_v3 = vpop.eup %3499  ;;  %v979_v13 = vadd.f32 1.0, %v3498_v36  ;;  %v859_v44 = vmul.f32 0.70710677, %v4077_v24  ;;  %v4083_v23 = vadd.f32 %v3141_v43, %v3827_v11  ;;  %v1083_v29 = vpack.c.bf16 %v1040_v56, %v1039_v51 }
 0x1a2   :  { %v699_v28 = vpop.f32.mrf.mxu0  ;;  %v3502_v33 = vpop.eup %3501  ;;  %v981_v25 = vadd.f32 1.0, %v3500_v3 }
 0x1a3   :  { %v4088_v6 = vadd.f32 %v3827_v11, %v699_v28  ;;  %v982_v19 = vadd.f32 1.0, %v3502_v33  ;;  %3513 = verf.f32 %v859_v44  ;;  %v862_v38 = vmul.f32 0.70710677, %v4083_v23  ;;  %3206 = vmatprep.mubr.bf16.mxu1 %v1083_v29 }
 0x1a4   :  { %v3504_v21 = vpop.eup %3503  ;;  %v3144_v40 = vpop.f32.mrf.mxu0  ;;  %3515 = verf.f32 %v861_v53  ;;  %3207 = vmatmul.mubr.bf16.gmra.mxu1 %v1084_v39  ;;  %v1043_v46 = vmul.f32 %v979_v13, %v787_v9  ;;  %v1045_v17 = vmul.f32 %v981_v25, %v789_v31  ;;  %v798_v25 = vmul.f32 0.5, %v4083_v23 }
 0x1a5   :  { %v980_v42 = vadd.f32 1.0, %v3504_v21  ;;  %v860_v32 = vmul.f32 0.70710677, %v4088_v6  ;;  %v4093_v26 = vadd.f32 %v3144_v40, %v3827_v11  ;;  %3517 = verf.f32 %v862_v38 }
 0x1a6   :  { %v712_v2 = vpop.f32.mrf.mxu0  ;;  %v1046_v34 = vmul.f32 %v982_v19, %v790_v37  ;;  %v3506_v27 = vpop.eup %3505  ;;  %v796_v38 = vmul.f32 0.5, %v4088_v6  ;;  %v797_v31 = vmul.f32 0.5, %v4071_v16 }
 0x1a7   :  { %v1044_v48 = vmul.f32 %v980_v42, %v788_v14  ;;  %3519 = verf.f32 %v860_v32  ;;  %v865_v35 = vmul.f32 0.70710677, %v4093_v26  ;;  %v4098_v30 = vadd.f32 %v3827_v11, %v712_v2 }
 0x1a8   :  { %v3145_v54 = vpop.f32.mrf.mxu0  ;;  %v3508_v55 = vpop.eup %3507  ;;  %v1086_v4 = vpack.c.bf16 %v1046_v34, %v1045_v17  ;;  %v985_v7 = vadd.f32 1.0, %v3506_v27 }
 0x1a9   :  { %v4101_v45 = vadd.f32 %v3145_v54, %v3827_v11  ;;  %v1085_v5 = vpack.c.bf16 %v1044_v48, %v1043_v46  ;;  %v863_v59 = vmul.f32 0.70710677, %v4098_v30  ;;  %3521 = verf.f32 %v865_v35 }
 0x1aa   :  { %v715_v60 = vpop.f32.mrf.mxu0  ;;  %v3510_v61 = vpop.eup %3509  ;;  %v983_v8 = vadd.f32 1.0, %v3508_v55  ;;  %v1049_v51 = vmul.f32 %v985_v7, %v793_v58 }
 0x1ab   :  { %v866_v62 = vmul.f32 0.70710677, %v4101_v45  ;;  %v4107_v63 = vadd.f32 %v3827_v11, %v715_v60  ;;  %3210 = vmatprep.mubr.bf16.mxu1 %v1085_v5  ;;  %v986_v10 = vadd.f32 1.0, %v3510_v61  ;;  %3523 = verf.f32 %v863_v59 }
 0x1ac   :  { %v3148_v12 = vpop.f32.mrf.mxu0  ;;  %v3512_v15 = vpop.eup %3511  ;;  %3211 = vmatmul.mubr.bf16.gmra.mxu1 %v1086_v4  ;;  %v791_v11 = vmul.f32 0.5, %v4057_v50  ;;  %v795_v50 = vmul.f32 0.5, %v4077_v24  ;;  %v799_v60 = vmul.f32 0.5, %v4098_v30  ;;  %v802_v4 = vmul.f32 0.5, %v4101_v45 }
 0x1ad   :  { %3525 = verf.f32 %v866_v62  ;;  %v864_v18 = vmul.f32 0.70710677, %v4107_v63  ;;  %v4114_v20 = vadd.f32 %v3553_v52, %v3148_v12  ;;  %v1050_v0 = vmul.f32 %v986_v10, %v794_v1 }
 0x1ae   :  { %v984_v22 = vadd.f32 1.0, %v3512_v15  ;;  %v728_v36 = vpop.f32.mrf.mxu0  ;;  %v1047_v56 = vmul.f32 %v983_v8, %v791_v11  ;;  %v800_v7 = vmul.f32 0.5, %v4107_v63  ;;  %v801_v12 = vmul.f32 0.5, %v4093_v26 }
 0x1af   :  { %3527 = verf.f32 %v864_v18  ;;  %v869_v47 = vmul.f32 0.70710677, %v4114_v20  ;;  %v4119_v3 = vadd.f32 %v3553_v52, %v728_v36  ;;  %v1088_v29 = vpack.c.bf16 %v1050_v0, %v1049_v51 }
 0x1b0   :  { %v1048_v43 = vmul.f32 %v984_v22, %v792_v57  ;;  %v3149_v41 = vpop.f32.mrf.mxu0  ;;  %v3514_v9 = vpop.eup %3513 }
 0x1b1   :  { %v4121_v53 = vadd.f32 %v3553_v52, %v3149_v41  ;;  %v3516_v13 = vpop.eup %3515  ;;  %v867_v44 = vmul.f32 0.70710677, %v4119_v3  ;;  %v987_v37 = vadd.f32 1.0, %v3514_v9  ;;  %3529 = verf.f32 %v869_v47 }
 0x1b2   :  { %v731_v49 = vpop.f32.mrf.mxu0  ;;  %v1087_v28 = vpack.c.bf16 %v1048_v43, %v1047_v56  ;;  %v3518_v33 = vpop.eup %3517  ;;  %v989_v40 = vadd.f32 1.0, %v3516_v13  ;;  %v803_v56 = vmul.f32 0.5, %v4119_v3 }
 0x1b3   :  { %v870_v14 = vmul.f32 0.70710677, %v4121_v53  ;;  %v732_v39 = vadd.f32 %v3553_v52, %v731_v49  ;;  %v990_v19 = vadd.f32 1.0, %v3518_v33  ;;  %3531 = verf.f32 %v867_v44 }
 0x1b4   :  { %v3520_v21 = vpop.eup %3519  ;;  %3214 = vmatprep.mubr.bf16.mxu1 %v1087_v28  ;;  %v4128_v24 = vpop.f32.mrf.mxu0  ;;  %v1051_v2 = vmul.f32 %v987_v37, %v795_v50  ;;  %v1053_v27 = vmul.f32 %v989_v40, %v797_v31  ;;  %v806_v41 = vmul.f32 0.5, %v4121_v53  ;;  %v805_v44 = vmul.f32 0.5, %v4114_v20 }
 0x1b5   :  { %4608 = vst [vmem:[#allocation20_spill] sm:$0xff] %v4128_v24  ;;  %v988_v42 = vadd.f32 1.0, %v3520_v21  ;;  %3533 = verf.f32 %v870_v14  ;;  %v868_v32 = vmul.f32 0.70710677, %v732_v39  ;;  %3215 = vmatmul.mubr.bf16.gmra.mxu1 %v1088_v29  ;;  %v1054_v34 = vmul.f32 %v990_v19, %v798_v25 }
 0x1b6   :  { %v4131_v46 = vpop.f32.mrf.mxu0  ;;  %v3522_v23 = vpop.eup %3521  ;;  %v804_v9 = vmul.f32 0.5, %v732_v39 }
 0x1b7   :  { %4609 = vst [vmem:[#allocation21_spill] sm:$0xff] %v4131_v46  ;;  %v1052_v48 = vmul.f32 %v988_v42, %v796_v38  ;;  %3535 = verf.f32 %v868_v32  ;;  %v1090_v59 = vpack.c.bf16 %v1054_v34, %v1053_v27  ;;  %v993_v62 = vadd.f32 1.0, %v3522_v23 }
 0x1b8   :  { %v4133_v35 = vpop.f32.mrf.mxu0  ;;  %v3524_v6 = vpop.eup %3523 }
 0x1b9   :  { %4610 = vst [vmem:[#allocation22_spill] sm:$0xff] %v4133_v35  ;;  %v1089_v54 = vpack.c.bf16 %v1052_v48, %v1051_v2  ;;  %v991_v5 = vadd.f32 1.0, %v3524_v6  ;;  %v1057_v0 = vmul.f32 %v993_v62, %v801_v12 }
 0x1ba   :  { %v3526_v55 = vpop.eup %3525  ;;  %v4135_v17 = vpop.f32.mrf.mxu0 }
 0x1bb   :  { %4611 = vst [vmem:[#allocation23_spill] sm:$0xff] %v4135_v17  ;;  %v994_v1 = vadd.f32 1.0, %v3526_v55  ;;  %3218 = vmatprep.mubr.bf16.mxu1 %v1089_v54  ;;  %v1055_v15 = vmul.f32 %v991_v5, %v799_v60  ;;  %v2865_v17 = vld [vmem:[#allocation5 + $0x78] sm:$0xff]  }
 0x1bc   :  { %v3528_v16 = vpop.eup %3527  ;;  %v4138_v61 = vpop.f32.mrf.mxu0 }
 0x1bd   :  { %v992_v8 = vadd.f32 1.0, %v3528_v16  ;;  %3219 = vmatmul.mubr.bf16.gmra.mxu1 %v1090_v59  ;;  %v1058_v58 = vmul.f32 %v994_v1, %v802_v4  ;;  %v4606_v16 = vmov 1.0  }
 0x1be   :  { %v4142_v10 = vpop.f32.mrf.mxu0  ;;  %v3530_v52 = vpop.eup %3529 }
 0x1bf   :  { %4612 = vst [vmem:[#allocation24_spill] sm:$0xff] %v4142_v10  ;;  %v1056_v18 = vmul.f32 %v992_v8, %v800_v7  ;;  %v1092_v47 = vpack.c.bf16 %v1058_v58, %v1057_v0  ;;  %v997_v43 = vadd.f32 1.0, %v3530_v52  ;;  %v4215_v58 = vld [vmem:[#allocation5 + $0x28] sm:$0xff]   ;;  %v4225_v0 = vld [vmem:[%s4604_s8] ss:$0 sm:$0xff]  ;;  %s3734_s8 = smov [#allocation14]  }
 0x1c0   :  { %v4145_v11 = vpop.f32.mrf.mxu0  ;;  %v3532_v30 = vpop.eup %3531  ;;  %s2621_s23 = sshll.u32 %s3734_s8, 4  ;;  %s2622_s23 = int_to_ptr.vmem [resolvable:$true] %s2621_s23 }
 0x1c1   :  { %v1091_v57 = vpack.c.bf16 %v1056_v18, %v1055_v15  ;;  %v995_v45 = vadd.f32 1.0, %v3532_v30  ;;  %v1061_v37 = vmul.f32 %v997_v43, %v805_v44  ;;  %v2745_v30 = vunpack.c.l.bf16 %v4215_v58  ;;  %s3694_s24 = scalar_lea.vmem %s2622_s23, 512  ;;  %p3699_p8 = scmp.lt.s32.totalorder %s2622_s23, %s2622_s23 }
 0x1c2   :  { %v3534_v22 = vpop.eup %3533  ;;  %v4147_v36 = vpop.f32.mrf.mxu0  ;;  %p3695_p7 = scmp.ne.s32.totalorder %s2622_s23, %s3694_s24  ;;  %p3700_p9 = scmp.lt.s32.totalorder %s3694_s24, %s3694_s24 }
 0x1c3   :  { %4613 = vst [vmem:[#allocation25_spill] sm:$0xff] %v4147_v36  ;;  %v998_v63 = vadd.f32 1.0, %v3534_v22  ;;  %3222 = vmatprep.mubr.bf16.mxu1 %v1091_v57  ;;  %v1059_v49 = vmul.f32 %v995_v45, %v803_v56 }
 0x1c4   :  { %v3536_v51 = vpop.eup %3535  ;;  %v3256_v26 = vpop.f32.mrf.mxu0  ;;  %p3701_p10 = por %p3700_p9, %p3699_p8 }
 0x1c5   :  { %v996_v13 = vadd.f32 1.0, %v3536_v51  ;;  %3223 = vmatmul.mubr.bf16.gmra.mxu1 %v1092_v47  ;;  %v1062_v28 = vmul.f32 %v998_v63, %v806_v41 }
 0x1c6   :  { %v4151_v50 = vpop.f32.mrf.mxu0  ;;  %p3702_p11 = pnand %p3701_p10, %p3695_p7 }
 0x1c7   :  { %v1060_v29 = vmul.f32 %v996_v13, %v804_v9  ;;  %v1094_v3 = vpack.c.bf16 %v1062_v28, %v1061_v37 }
 0x1c8   :  { %v4154_v33 = vpop.f32.mrf.mxu0 }
 0x1c9   :  { %v1093_v14 = vpack.c.bf16 %v1060_v29, %v1059_v49 }
 0x1ca   :  { %v4156_v21 = vpop.f32.mrf.mxu0 }
 0x1cb   :  { %3226 = vmatprep.mubr.bf16.mxu1 %v1093_v14 }
 0x1cc   :  { %v4158_v53 = vpop.f32.mrf.mxu0 }
 0x1cd   :  { %3227 = vmatmul.mubr.bf16.gmra.mxu1 %v1094_v3 }
 0x1ce   :  { %v4160_v39 = vpop.f32.mrf.mxu0  ;;  %3034 = vmatprep.mubr.f32.mxu1 %v4606_v16 }
 0x1d0   :  { %v4162_v25 = vpop.f32.mrf.mxu0 }
 0x1d2   :  { %v4164_v19 = vpop.f32.mrf.mxu0 }
 0x1d4   :  { %v4166_v20 = vpop.f32.mrf.mxu0 }
 0x1d5   :  { %4614 = vst [vmem:[#allocation26_spill] sm:$0xff] %v4166_v20 }
 0x1d6   :  { %v4168_v38 = vpop.f32.mrf.mxu0 }
 0x1d7   :  { %4615 = vst [vmem:[#allocation27_spill] sm:$0xff] %v4168_v38 }
 0x1d8   :  { %v4170_v40 = vpop.f32.mrf.mxu0 }
 0x1d9   :  { %4616 = vst [vmem:[#allocation28_spill] sm:$0xff] %v4170_v40 }
 0x1da   :  { %v4172_v42 = vpop.f32.mrf.mxu0 }
 0x1db   :  { %4617 = vst [vmem:[#allocation29_spill] sm:$0xff] %v4172_v42 }
 0x1dc   :  { %v4174_v32 = vpop.f32.mrf.mxu0 }
 0x1de   :  { %v4176_v31 = vpop.f32.mrf.mxu0 }
 0x1df   :  { %4618 = vst [vmem:[#allocation30_spill] sm:$0xff] %v4176_v31  ;;  %v2864_v31 = vld [vmem:[#allocation5 + $0x70] sm:$0xff]  }
 0x1e0   :  { %v4178_v2 = vpop.f32.mrf.mxu0 }
 0x1e2   :  { %v4180_v34 = vpop.f32.mrf.mxu0 }
 0x1e3   :  { %4619 = vst [vmem:[#allocation31_spill] sm:$0xff] %v4180_v34 }
 0x1e4   :  { %v4182_v48 = vpop.f32.mrf.mxu0 }
 0x1e6   :  { %v4184_v23 = vpop.f32.mrf.mxu0 }
 0x1e8   :  { %v4186_v6 = vpop.f32.mrf.mxu0 }
 0x1ea   :  { %v4188_v27 = vpop.f32.mrf.mxu0 }
 0x1ec   :  { %v4190_v54 = vpop.f32.mrf.mxu0 }
 0x1ee   :  { %v4192_v55 = vpop.f32.mrf.mxu0 }
 0x1f0   :  { %v4196_v1 = vpop.f32.mrf.mxu0 }
 0x1f2   :  { %v4203_v62 = vpop.f32.mrf.mxu0 }
 0x1f4   :  { %v4209_v8 = vpop.f32.mrf.mxu0 }
 0x1f5   :  { %4624 = vst [vmem:[#allocation36_spill] sm:$0xff] %v4209_v8 }
 0x1f6   :  { %v4217_v18 = vpop.f32.mrf.mxu0 }
 0x1f7   :  { %4625 = vst [vmem:[#allocation37_spill] sm:$0xff] %v4217_v18 }
 0x1f8   :  { %v4227_v22 = vpop.f32.mrf.mxu0 }
 0x1f9   :  { %4626 = vst [vmem:[#allocation38_spill] sm:$0xff] %v4227_v22 }
 0x1fa   :  { %v4234_v56 = vpop.f32.mrf.mxu0 }
 0x1fb   :  { %4627 = vst [vmem:[#allocation39_spill] sm:$0xff] %v4234_v56 }
 0x1fc   :  { %v4240_v13 = vpop.f32.mrf.mxu0 }
 0x1fd   :  { %4628 = vst [vmem:[#allocation40_spill] sm:$0xff] %v4240_v13 }
 0x1fe   :  { %v4244_v28 = vpop.f32.mrf.mxu0 }
 0x1ff   :  { %4629 = vst [vmem:[#allocation41_spill] sm:$0xff] %v4244_v28 }
 0x200   :  { %v4248_v14 = vpop.f32.mrf.mxu0 }
 0x201   :  { %4631 = vst [vmem:[#allocation43_spill] sm:$0xff] %v4248_v14 }
 0x214   :  { %v4194_v5 = vpop.f32.mrf.mxu1 }
 0x215   :  { %4620 = vst [vmem:[#allocation32_spill] sm:$0xff] %v4194_v5 }
 0x216   :  { %v4198_v59 = vpop.f32.mrf.mxu1 }
 0x217   :  { %4621 = vst [vmem:[#allocation33_spill] sm:$0xff] %v4198_v59  ;;  %v2857_v59 = vld [vmem:[#allocation5 + $0x38] sm:$0xff]  }
 0x218   :  { %v4201_v60 = vpop.f32.mrf.mxu1  ;;  %v2754_v24 = vunpack.c.h.bf16 %v2857_v59  ;;  %v2753_v10 = vunpack.c.l.bf16 %v2857_v59 }
 0x219   :  { %4622 = vst [vmem:[#allocation34_spill] sm:$0xff] %v4201_v60  ;;  %v2782_v60 = vunpack.c.h.bf16 %v2864_v31 }
 0x21a   :  { %v4205_v4 = vpop.f32.mrf.mxu1 }
 0x21b   :  { %4623 = vst [vmem:[#allocation35_spill] sm:$0xff] %v4205_v4  ;;  %v2785_v4 = vunpack.c.l.bf16 %v2865_v17 }
 0x21c   :  { %v4207_v7 = vpop.f32.mrf.mxu1 }
 0x21e   :  { %v4211_v12 = vpop.f32.mrf.mxu1 }
 0x220   :  { %v4213_v15 = vpop.f32.mrf.mxu1 }
 0x222   :  { %v4219_v52 = vpop.f32.mrf.mxu1 }
 0x224   :  { %v3176_v57 = vpop.f32.mrf.mxu1 }
 0x225   :  { %v1241_v45 = vadd.f32 %v3176_v57, %v4225_v0 }
 0x226   :  { %v4230_v63 = vpop.f32.mrf.mxu1 }
 0x227   :  { %v1593_v47 = vadd.f32 %v2745_v30, %v1241_v45 }
 0x228   :  { %v4232_v51 = vpop.f32.mrf.mxu1 }
 0x229   :  { %v4236_v43 = vmul.f32 %v3256_v26, %v1593_v47  ;;  %v4254_v26 = vpop.f32.mrf.mxu0 }
 0x22a   :  { %v4238_v41 = vpop.f32.mrf.mxu1  ;;  %4634 = vst [vmem:[#allocation46_spill] sm:$0xff] %v4254_v26 }
 0x22b   :  { %v4260_v47 = vpop.f32.mrf.mxu0 }
 0x22c   :  { %v3180_v9 = vpop.f32.mrf.mxu1 }
 0x22d   :  { %v4266_v56 = vpop.f32.mrf.mxu0 }
 0x22e   :  { %v4242_v44 = vpop.f32.mrf.mxu1  ;;  %4636 = vst [vmem:[#allocation48_spill] sm:$0xff] %v4266_v56 }
 0x22f   :  { %v4272_v28 = vpop.f32.mrf.mxu0 }
 0x230   :  { %v3181_v49 = vpop.f32.mrf.mxu1  ;;  %4637 = vst [vmem:[#allocation49_spill] sm:$0xff] %v4272_v28  ;;  %v2786_v28 = vunpack.c.h.bf16 %v2865_v17  ;;  %v2856_v17 = vld [vmem:[#allocation5 + $0x30] sm:$0xff]  }
 0x231   :  { %v4276_v14 = vpop.f32.mrf.mxu0  ;;  %v1260_v56 = vadd.f32 %v3181_v49, %v4225_v0 }
 0x232   :  { %v1251_v29 = vpop.f32.mrf.mxu1  ;;  %4638 = vst [vmem:[#allocation50_spill] sm:$0xff] %v4276_v14 }
 0x233   :  { %v4280_v42 = vpop.f32.mrf.mxu0  ;;  %v1598_v5 = vadd.f32 %v2754_v24, %v1260_v56  ;;  %v1252_v59 = vadd.f32 %v4225_v0, %v1251_v29  ;;  %v2750_v24 = vunpack.c.h.bf16 %v2856_v17 }
 0x234   :  { %v4246_v37 = vpop.f32.mrf.mxu1  ;;  %4639 = vst [vmem:[#allocation51_spill] sm:$0xff] %v4280_v42 }
 0x235   :  { %4630 = vst [vmem:[#allocation42_spill] sm:$0xff] %v4246_v37  ;;  %v4284_v40 = vpop.f32.mrf.mxu0 }
 0x236   :  { %v4250_v3 = vpop.f32.mrf.mxu1  ;;  %4640 = vst [vmem:[#allocation52_spill] sm:$0xff] %v4284_v40 }
 0x237   :  { %4632 = vst [vmem:[#allocation44_spill] sm:$0xff] %v4250_v3 }
 0x238   :  { %v4252_v30 = vpop.f32.mrf.mxu1 }
 0x239   :  { %4633 = vst [vmem:[#allocation45_spill] sm:$0xff] %v4252_v30 }
 0x23a   :  { %v4256_v57 = vpop.f32.mrf.mxu1 }
 0x23b   :  { %4635 = vst [vmem:[#allocation47_spill] sm:$0xff] %v4256_v57  ;;  %v1257_v57 = vadd.f32 %v3180_v9, %v4225_v0  ;;  %v2781_v9 = vunpack.c.l.bf16 %v2864_v31 }
 0x23c   :  { %v4258_v45 = vpop.f32.mrf.mxu1 }
 0x23d   :  { %v1597_v30 = vadd.f32 %v2753_v10, %v1257_v57 }
 0x23e   :  { %v4262_v16 = vpop.f32.mrf.mxu1 }
 0x23f   :  { %v2270_v10 = vmul.f32 %v4158_v53, %v1597_v30  ;;  %v1244_v53 = vadd.f32 %v4232_v51, %v4225_v0 }
 0x240   :  { %v4264_v18 = vpop.f32.mrf.mxu1 }
 0x242   :  { %v4268_v8 = vpop.f32.mrf.mxu1 }
 0x244   :  { %v4270_v22 = vpop.f32.mrf.mxu1 }
 0x246   :  { %v4274_v13 = vpop.f32.mrf.mxu1 }
 0x248   :  { %v3193_v26 = vpop.f32.mrf.mxu1 }
 0x24a   :  { %v4278_v46 = vpop.f32.mrf.mxu1 }
 0x24c   :  { %v3196_v38 = vpop.f32.mrf.mxu1 }
 0x24d   :  { %v1321_v3 = vadd.f32 %v3196_v38, %v4225_v0  ;;  %v4291_v38 = vpop.f32.mrf.mxu0 }
 0x24e   :  { %v1312_v20 = vpop.f32.mrf.mxu1 }
 0x24f   :  { %v1613_v37 = vadd.f32 %v2785_v4, %v1321_v3  ;;  %v1313_v4 = vadd.f32 %v4225_v0, %v1312_v20  ;;  %v4302_v3 = vpop.f32.mrf.mxu0 }
 0x250   :  { %v3197_v35 = vpop.f32.mrf.mxu1 }
 0x251   :  { %v1324_v14 = vadd.f32 %v3197_v35, %v4225_v0  ;;  %v2271_v35 = vmul.f32 %v4162_v25, %v1598_v5  ;;  %v2749_v25 = vunpack.c.l.bf16 %v2856_v17  ;;  %v1596_v5 = vadd.f32 %v2750_v24, %v1252_v59  ;;  %v4326_v24 = vld [vmem:[#allocation5 + $0xa8] sm:$0xff]  }
 0x252   :  { %v1315_v42 = vpop.f32.mrf.mxu1 }
 0x253   :  { %v1614_v36 = vadd.f32 %v2786_v28, %v1324_v14  ;;  %v1316_v49 = vadd.f32 %v4225_v0, %v1315_v42  ;;  %v2286_v28 = vmul.f32 %v4190_v54, %v1613_v37  ;;  %v1611_v54 = vadd.f32 %v2781_v9, %v1313_v4  ;;  %v4313_v37 = vpop.f32.mrf.mxu0 }
 0x254   :  { %v4289_v34 = vpop.f32.mrf.mxu1  ;;  %4643 = vst [vmem:[#allocation55_spill] sm:$0xff] %v4313_v37  ;;  %v2269_v57 = vmul.f32 %v4164_v19, %v1596_v5  ;;  %v2854_v5 = vld [vmem:[#allocation5 + $0x20] sm:$0xff]  }
 0x255   :  { %v2287_v40 = vmul.f32 %v4196_v1, %v1614_v36  ;;  %v1612_v42 = vadd.f32 %v2782_v60, %v1316_v49  ;;  %v1249_v36 = vadd.f32 %v4225_v0, %v4242_v44  ;;  %v2863_v1 = vld [vmem:[#allocation5 + $0x68] sm:$0xff]   ;;  %v2746_v44 = vunpack.c.h.bf16 %v4215_v58  ;;  %v4328_v51 = vpop.f32.mrf.mxu0  ;;  %v2862_v58 = vld [vmem:[#allocation5 + $0x60] sm:$0xff]  }
 0x256   :  { %v4296_v56 = vpop.f32.mrf.mxu1  ;;  %v2778_v31 = vunpack.c.h.bf16 %v2863_v1  ;;  %4644 = vst [vmem:[#allocation56_spill] sm:$0xff] %v4328_v51  ;;  %v2774_v9 = vunpack.c.h.bf16 %v2862_v58 }
 0x257   :  { %4641 = vst [vmem:[#allocation53_spill] sm:$0xff] %v4296_v56  ;;  %3002 = vmatprep.subr.mxu1 %v2287_v40  ;;  %v1308_v40 = vadd.f32 %v3193_v26, %v4225_v0  ;;  %v2285_v60 = vmul.f32 %v4203_v62, %v1612_v42  ;;  %v1595_v30 = vadd.f32 %v2749_v25, %v1249_v36  ;;  %v2777_v62 = vunpack.c.l.bf16 %v2863_v1  ;;  %v4337_v25 = vpop.f32.mrf.mxu0 }
 0x258   :  { %v4300_v14 = vpop.f32.mrf.mxu1  ;;  %3003 = vmatpush3.xpose.msra.mxu1 %v2271_v35  ;;  %v1305_v26 = vadd.f32 %v4270_v22, %v4225_v0  ;;  %v2284_v35 = vmul.f32 %v4192_v55, %v1611_v54  ;;  %v1594_v4 = vadd.f32 %v2746_v44, %v1244_v53  ;;  %v2773_v54 = vunpack.c.l.bf16 %v2862_v58 }
 0x259   :  { %3004 = vmatprep.subr.mxu1 %v2286_v28  ;;  %v1610_v17 = vadd.f32 %v2778_v31, %v1308_v40  ;;  %v2268_v19 = vmul.f32 %v4160_v39, %v1595_v30  ;;  %v1300_v28 = vadd.f32 %v4225_v0, %v4278_v46  ;;  %v1236_v40 = vadd.f32 %v4225_v0, %v4238_v41 }
 0x25a   :  { %v4307_v20 = vpop.f32.mrf.mxu1  ;;  %v1609_v22 = vadd.f32 %v2777_v62, %v1305_v26  ;;  %v2267_v39 = vmul.f32 %v4154_v33, %v1594_v4  ;;  %v2742_v31 = vunpack.c.h.bf16 %v2854_v5  ;;  %v1233_v41 = vadd.f32 %v4225_v0, %v4230_v63 }
 0x25b   :  { %4642 = vst [vmem:[#allocation54_spill] sm:$0xff] %v4307_v20  ;;  %v2283_v55 = vmul.f32 %v4186_v6, %v1610_v17  ;;  %v1297_v6 = vadd.f32 %v4225_v0, %v4274_v13  ;;  %v2741_v26 = vunpack.c.l.bf16 %v2854_v5  ;;  %v2861_v17 = vld [vmem:[#allocation5 + $0x58] sm:$0xff]   ;;  %v1228_v63 = vadd.f32 %v4213_v15, %v4225_v0 }
 0x25c   :  { %v4311_v29 = vpop.f32.mrf.mxu1  ;;  %3005 = vmatpush3.xpose.msra.mxu1 %v2270_v10  ;;  %v2809_v10 = vunpack.c.l.bf16 %v4326_v24  ;;  %v2282_v44 = vmul.f32 %v4182_v48, %v1609_v22  ;;  %v1592_v62 = vadd.f32 %v2742_v31, %v1236_v40  ;;  %v1292_v48 = vadd.f32 %v4264_v18, %v4225_v0  ;;  %v2860_v31 = vld [vmem:[#allocation5 + $0x50] sm:$0xff]  }
 0x25d   :  { %3006 = vmatprep.subr.mxu1 %v2285_v60  ;;  %v1608_v60 = vadd.f32 %v2774_v9, %v1300_v28  ;;  %v1607_v58 = vadd.f32 %v2773_v54, %v1297_v6  ;;  %v2853_v9 = vld [vmem:[#allocation5 + $0x18] sm:$0xff]   ;;  %v1591_v28 = vadd.f32 %v2741_v26, %v1233_v41  ;;  %v1225_v15 = vadd.f32 %v4207_v7, %v4225_v0  ;;  %v2852_v7 = vld [vmem:[#allocation5 + $0x10] sm:$0xff]  }
 0x25e   :  { %v4319_v49 = vpop.f32.mrf.mxu1  ;;  %v2738_v22 = vunpack.c.h.bf16 %v2853_v9  ;;  %v2766_v6 = vunpack.c.h.bf16 %v2860_v31  ;;  %v1220_v26 = vadd.f32 %v4225_v0, %v4219_v52  ;;  %v1217_v52 = vadd.f32 %v4225_v0, %v4211_v12  ;;  %v4649_v12 = vld [vmem:[#allocation34_spill] sm:$0xff] }
 0x25f   :  { %v2281_v4 = vmul.f32 %v4188_v27, %v1608_v60  ;;  %v1289_v27 = vadd.f32 %v4258_v45, %v4225_v0  ;;  %v2264_v40 = vmul.f32 %v4151_v50, %v1591_v28 }
 0x260   :  { %v4324_v59 = vpop.f32.mrf.mxu1  ;;  %3007 = vmatpush3.xpose.msra.mxu1 %v2269_v57  ;;  %v4350_v57 = vpop.f32.mrf.mxu0 }
 0x261   :  { %3008 = vmatprep.subr.mxu1 %v2284_v35  ;;  %4645 = vst [vmem:[#allocation57_spill] sm:$0xff] %v4350_v57  ;;  %v2770_v35 = vunpack.c.h.bf16 %v2861_v17 }
 0x262   :  { %v4331_v42 = vpop.f32.mrf.mxu1 }
 0x264   :  { %v3208_v36 = vpop.f32.mrf.mxu1  ;;  %3009 = vmatpush3.xpose.msra.mxu1 %v2268_v19 }
 0x265   :  { %v1369_v1 = vadd.f32 %v3208_v36, %v4225_v0  ;;  %3010 = vmatprep.subr.mxu1 %v2283_v55  ;;  %v2265_v55 = vmul.f32 %v4156_v21, %v1592_v62  ;;  %v1606_v36 = vadd.f32 %v2770_v35, %v1292_v48  ;;  %v1590_v21 = vadd.f32 %v2738_v22, %v1228_v63  ;;  %v2859_v22 = vld [vmem:[#allocation5 + $0x48] sm:$0xff]  }
 0x266   :  { %v4343_v46 = vpop.f32.mrf.mxu1  ;;  %v2734_v62 = vunpack.c.h.bf16 %v2852_v7 }
 0x267   :  { %v1625_v53 = vadd.f32 %v2809_v10, %v1369_v1  ;;  %v2769_v10 = vunpack.c.l.bf16 %v2861_v17  ;;  %v2279_v60 = vmul.f32 %v4178_v2, %v1606_v36  ;;  %v2263_v50 = vmul.f32 %v4145_v11, %v1590_v21 }
 0x268   :  { %v4348_v30 = vpop.f32.mrf.mxu1  ;;  %3011 = vmatpush3.xpose.msra.mxu1 %v2267_v39  ;;  %v2737_v39 = vunpack.c.l.bf16 %v2853_v9  ;;  %v2765_v2 = vunpack.c.l.bf16 %v2860_v31  ;;  %v2733_v9 = vunpack.c.l.bf16 %v2852_v7  ;;  %v1588_v63 = vadd.f32 %v2734_v62, %v1220_v26  ;;  %v4650_v31 = vld [vmem:[#allocation25_spill] sm:$0xff] }
 0x269   :  { %v4353_v33 = vmul.f32 %v4260_v47, %v1625_v53  ;;  %3012 = vmatprep.subr.mxu1 %v2282_v44  ;;  %v4365_v47 = vpop.f32.mrf.mxu0  ;;  %v1605_v45 = vadd.f32 %v2769_v10, %v1289_v27  ;;  %v4648_v10 = vld [vmem:[#allocation31_spill] sm:$0xff]  ;;  %v2761_v7 = vunpack.c.l.bf16 %v2859_v22 }
 0x26a   :  { %v4357_v13 = vpop.f32.mrf.mxu1  ;;  %v1589_v41 = vadd.f32 %v2737_v39, %v1225_v15  ;;  %v1212_v39 = vadd.f32 %v4649_v12, %v4225_v0 }
 0x26b   :  { %v4377_v1 = vpop.f32.mrf.mxu0  ;;  %v2278_v35 = vmul.f32 %v4174_v32, %v1605_v45  ;;  %v2762_v32 = vunpack.c.h.bf16 %v2859_v22  ;;  %v2261_v45 = vmul.f32 %v4650_v31, %v1588_v63  ;;  %v2858_v63 = vld [vmem:[#allocation5 + $0x40] sm:$0xff]  }
 0x26c   :  { %v4362_v19 = vpop.f32.mrf.mxu1  ;;  %3013 = vmatpush3.xpose.msra.mxu1 %v4236_v43  ;;  %v2280_v43 = vmul.f32 %v4184_v23, %v1607_v58  ;;  %v1284_v23 = vadd.f32 %v4225_v0, %v4268_v8  ;;  %v1281_v8 = vadd.f32 %v4225_v0, %v4262_v16  ;;  %v2262_v11 = vmul.f32 %v4138_v61, %v1589_v41  ;;  %v4647_v16 = vld [vmem:[#allocation45_spill] sm:$0xff]  ;;  %v2851_v61 = vld [vmem:[#allocation5 + $0x8] sm:$0xff]  }
 0x26d   :  { %3014 = vmatprep.subr.mxu1 %v2281_v4  ;;  %v4389_v44 = vpop.f32.mrf.mxu0  ;;  %v2730_v21 = vunpack.c.h.bf16 %v2851_v61 }
 0x26e   :  { %v4370_v18 = vpop.f32.mrf.mxu1  ;;  %v1604_v48 = vadd.f32 %v2766_v6, %v1284_v23  ;;  %v1603_v27 = vadd.f32 %v2765_v2, %v1281_v8  ;;  %v4651_v6 = vld [vmem:[#allocation42_spill] sm:$0xff]  ;;  %v4653_v2 = vld [vmem:[#allocation32_spill] sm:$0xff] }
 0x26f   :  { %v4401_v4 = vpop.f32.mrf.mxu0 }
 0x270   :  { %v4375_v5 = vpop.f32.mrf.mxu1  ;;  %3015 = vmatpush3.xpose.msra.mxu1 %v2265_v55  ;;  %v1276_v55 = vadd.f32 %v4647_v16, %v4225_v0  ;;  %v2277_v36 = vmul.f32 %v4648_v10, %v1604_v48  ;;  %v1209_v48 = vadd.f32 %v4653_v2, %v4225_v0  ;;  %v4656_v10 = vld [vmem:[#allocation28_spill] sm:$0xff] }
 0x271   :  { %3016 = vmatprep.subr.mxu1 %v2280_v43  ;;  %v4413_v15 = vpop.f32.mrf.mxu0 }
 0x272   :  { %v4382_v54 = vpop.f32.mrf.mxu1  ;;  %v1602_v41 = vadd.f32 %v2762_v32, %v1276_v55  ;;  %v4655_v55 = vld [vmem:[#allocation47_spill] sm:$0xff] }
 0x273   :  { %v4425_v8 = vpop.f32.mrf.mxu0  ;;  %v1268_v32 = vadd.f32 %v4225_v0, %v4655_v55 }
 0x274   :  { %3017 = vmatpush3.xpose.msra.mxu1 %v2264_v40  ;;  %v1587_v40 = vadd.f32 %v2733_v9, %v1217_v52  ;;  %v4654_v52 = vld [vmem:[#allocation24_spill] sm:$0xff] }
 0x275   :  { %v4387_v53 = vpop.f32.mrf.mxu1  ;;  %3018 = vmatprep.subr.mxu1 %v2279_v60  ;;  %v1273_v60 = vadd.f32 %v4651_v6, %v4225_v0  ;;  %v4437_v31 = vpop.f32.mrf.mxu0 }
 0x276   :  { %v2260_v9 = vmul.f32 %v4654_v52, %v1587_v40  ;;  %v4658_v40 = vld [vmem:[#allocation35_spill] sm:$0xff]  ;;  %v4660_v52 = vld [vmem:[#allocation26_spill] sm:$0xff] }
 0x277   :  { %v4394_v17 = vpop.f32.mrf.mxu1  ;;  %v1601_v22 = vadd.f32 %v2761_v7, %v1273_v60  ;;  %v1204_v6 = vadd.f32 %v4225_v0, %v4658_v40 }
 0x278   :  { %4646 = vst [vmem:[#allocation58_spill] sm:$0xff] %v4394_v17  ;;  %3019 = vmatpush3.xpose.msra.mxu1 %v2263_v50  ;;  %v4652_v50 = vld [vmem:[#allocation30_spill] sm:$0xff] }
 0x279   :  { %v4399_v58 = vpop.f32.mrf.mxu1  ;;  %3020 = vmatprep.subr.mxu1 %v2278_v35  ;;  %v2276_v26 = vmul.f32 %v4652_v50, %v1603_v27  ;;  %v2729_v35 = vunpack.c.l.bf16 %v2851_v61  ;;  %v2758_v27 = vunpack.c.h.bf16 %v2858_v63  ;;  %v4659_v50 = vld [vmem:[#allocation44_spill] sm:$0xff] }
 0x27b   :  { %v4406_v28 = vpop.f32.mrf.mxu1  ;;  %v1585_v61 = vadd.f32 %v2729_v35, %v1209_v48  ;;  %v1600_v2 = vadd.f32 %v2758_v27, %v1268_v32  ;;  %v4661_v48 = vld [vmem:[#allocation20_spill] sm:$0xff] }
 0x27c   :  { %3021 = vmatpush3.xpose.msra.mxu1 %v2262_v11  ;;  %v1586_v11 = vadd.f32 %v2730_v21, %v1212_v39  ;;  %v4657_v39 = vld [vmem:[#allocation22_spill] sm:$0xff] }
 0x27d   :  { %v4411_v43 = vpop.f32.mrf.mxu1  ;;  %3022 = vmatprep.subr.mxu1 %v2277_v36  ;;  %v2275_v36 = vmul.f32 %v4656_v10, %v1602_v41  ;;  %v2757_v41 = vunpack.c.l.bf16 %v2858_v63  ;;  %v4449_v10 = vpop.f32.mrf.mxu0  ;;  %v2258_v35 = vmul.f32 %v4661_v48, %v1585_v61  ;;  %v4663_v63 = vld [vmem:[#allocation29_spill] sm:$0xff]  ;;  %v1388_v61 = vadd.f32 %v4375_v5, %v4225_v0 }
 0x27e   :  { %v2259_v21 = vmul.f32 %v4657_v39, %v1586_v11  ;;  %v4662_v11 = vld [vmem:[#allocation33_spill] sm:$0xff]  ;;  %v2273_v32 = vmul.f32 %v4663_v63, %v1600_v2 }
 0x27f   :  { %v4418_v23 = vpop.f32.mrf.mxu1 }
 0x280   :  { %3023 = vmatpush3.xpose.msra.mxu1 %v2261_v45  ;;  %v2724_v45 = vld [vmem:[#allocation5] sm:$0xff]  }
 0x281   :  { %v4423_v62 = vpop.f32.mrf.mxu1  ;;  %3024 = vmatprep.subr.mxu1 %v2276_v26  ;;  %v2726_v60 = vunpack.c.h.bf16 %v2724_v45  ;;  %v1265_v26 = vadd.f32 %v4225_v0, %v4659_v50  ;;  %v2725_v39 = vunpack.c.l.bf16 %v2724_v45 }
 0x283   :  { %v4430_v16 = vpop.f32.mrf.mxu1  ;;  %v1584_v40 = vadd.f32 %v2726_v60, %v1204_v6  ;;  %v1599_v50 = vadd.f32 %v2757_v41, %v1265_v26  ;;  %v4665_v26 = vld [vmem:[#allocation27_spill] sm:$0xff] }
 0x284   :  { %3025 = vmatpush3.xpose.msra.mxu1 %v2260_v9  ;;  %v2274_v9 = vmul.f32 %v4660_v52, %v1601_v22  ;;  %v2881_v22 = vld [vmem:[#allocation5 + $0xf8] sm:$0xff]   ;;  %v3308_v52 = vpop.f32.mrf.mxu0 }
 0x285   :  { %v4435_v12 = vpop.f32.mrf.mxu1  ;;  %3026 = vmatprep.subr.mxu1 %v2275_v36  ;;  %v1201_v36 = vadd.f32 %v4225_v0, %v4662_v11  ;;  %v2849_v60 = vunpack.c.l.bf16 %v2881_v22  ;;  %v2272_v41 = vmul.f32 %v4665_v26, %v1599_v50  ;;  %v2850_v2 = vunpack.c.h.bf16 %v2881_v22 }
 0x287   :  { %v4442_v7 = vpop.f32.mrf.mxu1  ;;  %v1583_v57 = vadd.f32 %v2725_v39, %v1201_v36  ;;  %v4666_v36 = vld [vmem:[#allocation21_spill] sm:$0xff] }
 0x288   :  { %3027 = vmatpush3.xpose.msra.mxu1 %v2259_v21  ;;  %v2873_v21 = vld [vmem:[#allocation5 + $0xb8] sm:$0xff]  }
 0x289   :  { %v4447_v55 = vpop.f32.mrf.mxu1  ;;  %3028 = vmatprep.subr.mxu1 %v2274_v9  ;;  %v4664_v9 = vld [vmem:[#allocation23_spill] sm:$0xff]  ;;  %v2818_v48 = vunpack.c.h.bf16 %v2873_v21  ;;  %v2256_v39 = vmul.f32 %v4666_v36, %v1583_v57  ;;  %v2817_v5 = vunpack.c.l.bf16 %v2873_v21  ;;  %v1380_v57 = vadd.f32 %v4225_v0, %v4382_v54 }
 0x28a   :  { %v2257_v56 = vmul.f32 %v4664_v9, %v1584_v40  ;;  %v1385_v40 = vadd.f32 %v4362_v19, %v4225_v0  ;;  %v2880_v9 = vld [vmem:[#allocation5 + $0xf0] sm:$0xff]  }
 0x28b   :  { %v4454_v51 = vpop.f32.mrf.mxu1  ;;  %v2846_v22 = vunpack.c.h.bf16 %v2880_v9 }
 0x28c   :  { %3029 = vmatpush3.xpose.msra.mxu1 %v2258_v35  ;;  %v2241_v35 = vpop.f32.mrf.mxu0 }
 0x28d   :  { %v3228_v27 = vpop.f32.mrf.mxu1  ;;  %3030 = vmatprep.subr.mxu1 %v2273_v32  ;;  %v1630_v32 = vadd.f32 %v2818_v48, %v1388_v61  ;;  %v2845_v48 = vunpack.c.l.bf16 %v2880_v9  ;;  %v1433_v9 = vadd.f32 %v4435_v12, %v4225_v0  ;;  %v1364_v12 = vadd.f32 %v4225_v0, %v4357_v13 }
 0x28e   :  { %v1449_v6 = vadd.f32 %v3228_v27, %v4225_v0  ;;  %v3309_v26 = vpop.f32.mrf.mxu0  ;;  %v1420_v13 = vadd.f32 %v4423_v62, %v4225_v0 }
 0x28f   :  { %v1440_v45 = vpop.f32.mrf.mxu1 }
 0x290   :  { %3031 = vmatpush3.xpose.msra.mxu1 %v2257_v56  ;;  %v1645_v27 = vadd.f32 %v2849_v60, %v1449_v6  ;;  %v2872_v56 = vld [vmem:[#allocation5 + $0xb0] sm:$0xff]   ;;  %v1441_v21 = vadd.f32 %v4225_v0, %v1440_v45  ;;  %v4667_v6 = vmov 1.0   ;;  %v4668_v60 = vld [vmem:[#allocation51_spill] sm:$0xff]  ;;  %v2244_v36 = vpop.f32.mrf.mxu0 }
 0x291   :  { %v3229_v11 = vpop.f32.mrf.mxu1  ;;  %3032 = vmatprep.subr.mxu1 %v2272_v41  ;;  %v2303_v41 = vmul.f32 %v4291_v38, %v1630_v32  ;;  %v2814_v19 = vunpack.c.h.bf16 %v2872_v56 }
 0x292   :  { %v1452_v63 = vadd.f32 %v3229_v11, %v4225_v0  ;;  %v1629_v11 = vadd.f32 %v2817_v5, %v1385_v40  ;;  %v2318_v61 = vmul.f32 %v3308_v52, %v1645_v27  ;;  %v1436_v52 = vadd.f32 %v4447_v55, %v4225_v0 }
 0x293   :  { %v1443_v37 = vpop.f32.mrf.mxu1  ;;  %v1628_v38 = vadd.f32 %v2814_v19, %v1380_v57  ;;  %v1643_v45 = vadd.f32 %v2845_v48, %v1441_v21  ;;  %v1372_v40 = vadd.f32 %v4348_v30, %v4225_v0  ;;  %v2810_v5 = vunpack.c.h.bf16 %v4326_v24 }
 0x294   :  { %v1646_v17 = vadd.f32 %v2850_v2, %v1452_v63  ;;  %v1444_v50 = vadd.f32 %v4225_v0, %v1443_v37  ;;  %3033 = vmatpush3.xpose.msra.mxu1 %v2256_v39  ;;  %v2302_v54 = vmul.f32 %v4668_v60, %v1629_v11  ;;  %v2813_v2 = vunpack.c.l.bf16 %v2872_v56  ;;  %v2879_v63 = vld [vmem:[#allocation5 + $0xe8] sm:$0xff]   ;;  %v2878_v11 = vld [vmem:[#allocation5 + $0xe0] sm:$0xff]  }
 0x295   :  { %v2301_v32 = vmul.f32 %v4302_v3, %v1628_v38  ;;  %v2841_v27 = vunpack.c.l.bf16 %v2879_v63  ;;  %v1626_v55 = vadd.f32 %v2810_v5, %v1372_v40  ;;  %v1428_v30 = vadd.f32 %v4225_v0, %v4454_v51  ;;  %v2870_v3 = vld [vmem:[#allocation5 + $0xa0] sm:$0xff]  }
 0x296   :  { %v2319_v20 = vmul.f32 %v3309_v26, %v1646_v17  ;;  %v1644_v37 = vadd.f32 %v2846_v22, %v1444_v50  ;;  %v1377_v17 = vadd.f32 %v4225_v0, %v4370_v18  ;;  %v2316_v22 = vmul.f32 %v2241_v35, %v1643_v45  ;;  %v4669_v26 = vld [vmem:[#allocation52_spill] sm:$0xff]  ;;  %v4670_v35 = vld [vmem:[#allocation49_spill] sm:$0xff] }
 0x297   :  { %3035 = vmatmul.mubr.f32.vlgmr.msra.gmra.mxu1 %v4667_v6  ;;  %v1641_v57 = vadd.f32 %v2841_v27, %v1433_v9  ;;  %v2299_v19 = vmul.f32 %v4670_v35, %v1626_v55  ;;  %v2806_v21 = vunpack.c.h.bf16 %v2870_v3  ;;  %v1361_v51 = vadd.f32 %v4225_v0, %v4343_v46  ;;  %v4671_v46 = vld [vmem:[#allocation50_spill] sm:$0xff] }
 0x298   :  { %3036 = vmatprep.subr.mxu1 %v2319_v20  ;;  %3068 = vmatprep.mubr.f32.mxu1 %v4667_v6  ;;  %v2842_v20 = vunpack.c.h.bf16 %v2879_v63  ;;  %v2317_v39 = vmul.f32 %v2244_v36, %v1644_v37  ;;  %v1627_v18 = vadd.f32 %v2813_v2, %v1377_v17  ;;  %v2837_v37 = vunpack.c.l.bf16 %v2878_v11 }
 0x299   :  { %3037 = vmatpush3.xpose.msra.mxu1 %v2303_v41  ;;  %v2838_v41 = vunpack.c.h.bf16 %v2878_v11  ;;  %v2314_v48 = vmul.f32 %v4413_v15, %v1641_v57  ;;  %v1624_v60 = vadd.f32 %v2806_v21, %v1364_v12  ;;  %v2869_v15 = vld [vmem:[#allocation5 + $0x98] sm:$0xff]   ;;  %v1417_v45 = vadd.f32 %v4411_v43, %v4225_v0 }
 0x29a   :  { %3038 = vmatprep.subr.mxu1 %v2318_v61  ;;  %v1642_v50 = vadd.f32 %v2842_v20, %v1436_v52  ;;  %v2300_v56 = vmul.f32 %v4669_v26, %v1627_v18  ;;  %v1425_v61 = vadd.f32 %v4225_v0, %v4442_v7  ;;  %v1356_v7 = vadd.f32 %v4324_v59, %v4225_v0  ;;  %v4672_v18 = vld [vmem:[#allocation48_spill] sm:$0xff] }
 0x29b   :  { %v1640_v17 = vadd.f32 %v2838_v41, %v1428_v30  ;;  %v2802_v36 = vunpack.c.h.bf16 %v2869_v15  ;;  %v2297_v20 = vmul.f32 %v4671_v46, %v1624_v60  ;;  %v1412_v27 = vadd.f32 %v4225_v0, %v4430_v16 }
 0x29c   :  { %v2315_v24 = vmul.f32 %v4437_v31, %v1642_v50  ;;  %v2805_v31 = vunpack.c.l.bf16 %v2870_v3  ;;  %v1639_v38 = vadd.f32 %v2837_v37, %v1425_v61  ;;  %v1348_v55 = vadd.f32 %v4225_v0, %v4331_v42  ;;  %v2875_v42 = vld [vmem:[#allocation5 + $0xc8] sm:$0xff]   ;;  %v4675_v37 = vld [vmem:[#allocation46_spill] sm:$0xff] }
 0x29d   :  { %3039 = vmatpush3.xpose.msra.mxu1 %v2302_v54  ;;  %v2877_v54 = vld [vmem:[#allocation5 + $0xd8] sm:$0xff]   ;;  %v2313_v63 = vmul.f32 %v4449_v10, %v1640_v17  ;;  %v2801_v10 = vunpack.c.l.bf16 %v2869_v15  ;;  %v1622_v5 = vadd.f32 %v2802_v36, %v1356_v7  ;;  %v1409_v11 = vadd.f32 %v4225_v0, %v4418_v23  ;;  %v2866_v36 = vld [vmem:[#allocation5 + $0x80] sm:$0xff]  }
 0x29e   :  { %3040 = vmatprep.subr.mxu1 %v2317_v39  ;;  %v2834_v2 = vunpack.c.h.bf16 %v2877_v54  ;;  %v1623_v52 = vadd.f32 %v2805_v31, %v1361_v51  ;;  %v2833_v39 = vunpack.c.l.bf16 %v2877_v54  ;;  %v2312_v40 = vmul.f32 %v4425_v8, %v1639_v38  ;;  %v2874_v38 = vld [vmem:[#allocation5 + $0xc0] sm:$0xff]  }
 0x29f   :  { %v1404_v35 = vadd.f32 %v4399_v58, %v4225_v0  ;;  %v1340_v61 = vadd.f32 %v4300_v14, %v4225_v0  ;;  %v1401_v51 = vadd.f32 %v4387_v53, %v4225_v0  ;;  %v2825_v31 = vunpack.c.l.bf16 %v2875_v42 }
 0x2a0   :  { %v1638_v62 = vadd.f32 %v2834_v2, %v1420_v13  ;;  %v2296_v59 = vmul.f32 %v4672_v18, %v1623_v52  ;;  %v1637_v9 = vadd.f32 %v2833_v39, %v1417_v45  ;;  %v4676_v2 = vld [vmem:[#allocation41_spill] sm:$0xff]  ;;  %v1396_v15 = vadd.f32 %v4225_v0, %v4406_v28  ;;  %v4677_v52 = vld [vmem:[#allocation54_spill] sm:$0xff]  ;;  %v4682_v18 = vld [vmem:[#allocation36_spill] sm:$0xff] }
 0x2a1   :  { %3041 = vmatpush3.xpose.msra.mxu1 %v2301_v32  ;;  %v2876_v32 = vld [vmem:[#allocation5 + $0xd0] sm:$0xff]   ;;  %v2822_v7 = vunpack.c.h.bf16 %v2874_v38  ;;  %v1332_v46 = vadd.f32 %v4225_v0, %v4677_v52  ;;  %v2790_v45 = vunpack.c.h.bf16 %v2866_v36  ;;  %v4679_v39 = vld [vmem:[#allocation58_spill] sm:$0xff] }
 0x2a2   :  { %3042 = vmatprep.subr.mxu1 %v2316_v22  ;;  %v2311_v43 = vmul.f32 %v4389_v44, %v1638_v62  ;;  %v2830_v50 = vunpack.c.h.bf16 %v2876_v32  ;;  %v2868_v22 = vld [vmem:[#allocation5 + $0x90] sm:$0xff]   ;;  %v2310_v57 = vmul.f32 %v4365_v47, %v1637_v9  ;;  %v2829_v30 = vunpack.c.l.bf16 %v2876_v32  ;;  %v2867_v47 = vld [vmem:[#allocation5 + $0x88] sm:$0xff]  }
 0x2a3   :  { %v1345_v44 = vadd.f32 %v4225_v0, %v4319_v49  ;;  %v2797_v3 = vunpack.c.l.bf16 %v2868_v22  ;;  %v2793_v54 = vunpack.c.l.bf16 %v2867_v47  ;;  %v1393_v62 = vadd.f32 %v4225_v0, %v4679_v39 }
 0x2a4   :  { %v1636_v16 = vadd.f32 %v2830_v50, %v1412_v27  ;;  %v1635_v21 = vadd.f32 %v2829_v30, %v1409_v11  ;;  %v1632_v28 = vadd.f32 %v2822_v7, %v1396_v15  ;;  %v2789_v32 = vunpack.c.l.bf16 %v2866_v36 }
 0x2a5   :  { %3043 = vmatpush3.xpose.msra.mxu1 %v2300_v56  ;;  %v2798_v56 = vunpack.c.h.bf16 %v2868_v22  ;;  %v1619_v49 = vadd.f32 %v2797_v3, %v1345_v44  ;;  %v1616_v9 = vadd.f32 %v2790_v45, %v1332_v46 }
 0x2a6   :  { %3044 = vmatprep.subr.mxu1 %v2315_v24  ;;  %v4674_v24 = vld [vmem:[#allocation40_spill] sm:$0xff]  ;;  %v2309_v23 = vmul.f32 %v4401_v4, %v1636_v16  ;;  %v2308_v58 = vmul.f32 %v4377_v1, %v1635_v21  ;;  %v1337_v4 = vadd.f32 %v4289_v34, %v4225_v0  ;;  %v4678_v34 = vld [vmem:[#allocation38_spill] sm:$0xff]  ;;  %v4555_v16 = vld [vmem:[#allocation10] sm:$0xff] }
 0x2a7   :  { %v1620_v12 = vadd.f32 %v2798_v56, %v1348_v55  ;;  %v2292_v14 = vmul.f32 %v4676_v2, %v1619_v49  ;;  %v4686_v56 = vld [vmem:[#allocation37_spill] sm:$0xff] }
 0x2a8   :  { %v1617_v1 = vadd.f32 %v2793_v54, %v1337_v4 }
 0x2a9   :  { %3045 = vmatpush3.xpose.msra.mxu1 %v2299_v19  ;;  %v2826_v19 = vunpack.c.h.bf16 %v2875_v42  ;;  %v2293_v17 = vmul.f32 %v4675_v37, %v1620_v12 }
 0x2aa   :  { %3046 = vmatprep.subr.mxu1 %v2314_v48  ;;  %v2794_v48 = vunpack.c.h.bf16 %v2867_v47 }
 0x2ab   :  { %v1634_v60 = vadd.f32 %v2826_v19, %v1404_v35 }
 0x2ac   :  { %v1618_v13 = vadd.f32 %v2794_v48, %v1340_v61 }
 0x2ad   :  { %3047 = vmatpush3.xpose.msra.mxu1 %v4353_v33  ;;  %v1353_v33 = vadd.f32 %v4311_v29, %v4225_v0  ;;  %v4673_v29 = vld [vmem:[#allocation43_spill] sm:$0xff]  ;;  %v2307_v53 = vmul.f32 %v4337_v25, %v1634_v60  ;;  %v4681_v25 = vld [vmem:[#allocation53_spill] sm:$0xff] }
 0x2ae   :  { %3048 = vmatprep.subr.mxu1 %v2313_v63  ;;  %v2295_v26 = vmul.f32 %v4673_v29, %v1622_v5  ;;  %v1633_v63 = vadd.f32 %v2825_v31, %v1401_v51  ;;  %v1329_v5 = vadd.f32 %v4225_v0, %v4681_v25  ;;  %v4685_v29 = vld [vmem:[#allocation56_spill] sm:$0xff]  ;;  %v2322_v0 = vlaneseq }
 0x2af   :  { %v1621_v8 = vadd.f32 %v2801_v10, %v1353_v33  ;;  %v2821_v10 = vunpack.c.l.bf16 %v2874_v38 }
 0x2b0   :  { %v1615_v22 = vadd.f32 %v2789_v32, %v1329_v5 }
 0x2b1   :  { %3049 = vmatpush3.xpose.msra.mxu1 %v2297_v20  ;;  %v2294_v41 = vmul.f32 %v4674_v24, %v1621_v8  ;;  %v2291_v20 = vmul.f32 %v4678_v34, %v1618_v13  ;;  %v1631_v27 = vadd.f32 %v2821_v10, %v1393_v62  ;;  %v4684_v8 = vld [vmem:[#allocation39_spill] sm:$0xff] }
 0x2b2   :  { %3050 = vmatprep.subr.mxu1 %v2312_v40  ;;  %v4680_v40 = vld [vmem:[#allocation55_spill] sm:$0xff]  ;;  %v2289_v55 = vmul.f32 %v4684_v8, %v1616_v9  ;;  %v2288_v11 = vmul.f32 %v4686_v56, %v1615_v22 }
 0x2b3   :  { %v2306_v33 = vmul.f32 %v4680_v40, %v1633_v63 }
 0x2b5   :  { %3051 = vmatpush3.xpose.msra.mxu1 %v2296_v59  ;;  %v2290_v59 = vmul.f32 %v4682_v18, %v1617_v1 }
 0x2b6   :  { %3052 = vmatprep.subr.mxu1 %v2311_v43  ;;  %v4683_v43 = vld [vmem:[#allocation57_spill] sm:$0xff] }
 0x2b7   :  { %v2305_v50 = vmul.f32 %v4683_v43, %v1632_v28 }
 0x2b9   :  { %3053 = vmatpush3.xpose.msra.mxu1 %v2295_v26  ;;  %v2304_v26 = vmul.f32 %v4685_v29, %v1631_v27 }
 0x2ba   :  { %3054 = vmatprep.subr.mxu1 %v2310_v57  ;;  %v4550_v57 = vshrl.u32 %v2322_v0, 7 }
 0x2bc   :  { %v4553_v30 = vsub.s32 0, %v4550_v57  ;;  %v2328_v44 = vsub.s32 2, %v4550_v57  ;;  %v4564_v51 = vsub.s32 1, %v4550_v57  ;;  %vm2606_vm1 = vcmp.lt.s32.totalorder %v4550_v57, 4 }
 0x2bd   :  { %3055 = vmatpush3.xpose.msra.mxu1 %v2294_v41  ;;  %v2332_v9 = vsub.s32 4, %v4550_v57  ;;  %v2336_v27 = vsub.s32 6, %v4550_v57 }
 0x2be   :  { %3056 = vmatprep.subr.mxu1 %v2309_v23  ;;  %v2325_v24 = vrot.slane %v4555_v16, %v4553_v30  ;;  %v2329_v41 = vrot.slane %v4555_v16, %v2328_v44  ;;  %v2507_v4 = vrot.slane %v4555_v16, %v4564_v51 }
 0x2bf   :  { %v2333_v43 = vrot.slane %v4555_v16, %v2332_v9 }
 0x2c0   :  { %v2345_v3 = vrot.slane %v2325_v24, %v4553_v30  ;;  %v2349_v12 = vrot.slane %v2329_v41, %v4553_v30  ;;  %v2527_v2 = vrot.slane %v2507_v4, %v4564_v51 }
 0x2c1   :  { %3057 = vmatpush3.xpose.msra.mxu1 %v2293_v17  ;;  %v2353_v22 = vrot.slane %v2333_v43, %v4553_v30 }
 0x2c2   :  { %3058 = vmatprep.subr.mxu1 %v2308_v58  ;;  %v2510_v58 = vsub.s32 3, %v4550_v57 }
 0x2c4   :  { %v2511_v13 = vrot.slane %v4555_v16, %v2510_v58 }
 0x2c5   :  { %3059 = vmatpush3.xpose.msra.mxu1 %v2292_v14 }
 0x2c6   :  { %3060 = vmatprep.subr.mxu1 %v2307_v53  ;;  %v2531_v63 = vrot.slane %v2511_v13, %v4564_v51 }
 0x2c9   :  { %3061 = vmatpush3.xpose.msra.mxu1 %v2291_v20 }
 0x2ca   :  { %3062 = vmatprep.subr.mxu1 %v2306_v33 }
 0x2cd   :  { %3063 = vmatpush3.xpose.msra.mxu1 %v2290_v59 }
 0x2ce   :  { %3064 = vmatprep.subr.mxu1 %v2305_v50  ;;  %v2337_v50 = vrot.slane %v4555_v16, %v2336_v27 }
 0x2d0   :  { %v2357_v8 = vrot.slane %v2337_v50, %v4553_v30  ;;  %v2518_v30 = vsub.s32 7, %v4550_v57 }
 0x2d1   :  { %3065 = vmatpush3.xpose.msra.mxu1 %v2289_v55 }
 0x2d2   :  { %3066 = vmatprep.subr.mxu1 %v2304_v26 }
 0x2d5   :  { %3067 = vmatpush3.xpose.msra.mxu1 %v2288_v11 }
 0x2d8   :  { %3069 = vmatmul.mubr.f32.vlgmr.msra.gmra.mxu1 %v4667_v6 }
 0x357   :  { %v2424_v6 = vpop.f32.mrf.mxu1 }
 0x358   :  { %v2425_v42 = vadd.f32 %v2424_v6, %v2345_v3 }
 0x359   :  { %v2426_v35 = vpop.f32.mrf.mxu1 }
 0x35a   :  { %v2548_v19 = vand.u32 2147483647, %v2425_v42  ;;  %v2427_v21 = vadd.f32 %v2426_v35, %v2349_v12  ;;  %v2500_v15 = vmax.f32 %v2425_v42, 0.0  ;;  %v2540_v53 = vmul.f32 %v2527_v2, %v2425_v42 }
 0x35c   :  { %v2552_v23 = vsub.f32 0.0, %v2548_v19  ;;  %v2549_v47 = vand.u32 2147483647, %v2427_v21  ;;  %v2501_v1 = vmax.f32 %v2427_v21, 0.0  ;;  %v2541_v20 = vmul.f32 %v2531_v63, %v2427_v21 }
 0x35d   :  { %v2544_v39 = vsub.f32 %v2500_v15, %v2540_v53 }
 0x35e   :  { %v2556_v61 = vmul.f32 1.442695, %v2552_v23  ;;  %v2553_v48 = vsub.f32 0.0, %v2549_v47  ;;  %v2545_v25 = vsub.f32 %v2501_v1, %v2541_v20  ;;  %v2519_v47 = vrot.slane %v4555_v16, %v2518_v30 }
 0x360   :  { %3537 = vpow2.f32 %v2556_v61  ;;  %v2558_v49 = vmul.f32 1.442695, %v2553_v48 }
 0x362   :  { %3539 = vpow2.f32 %v2558_v49 }
 0x36d   :  { %v3538_v37 = vpop.eup %3537 }
 0x36e   :  { %v2564_v17 = vadd.f32 1.0, %v3538_v37  ;;  %v2567_v54 = vmul.f32 -0.5, %v3538_v37  ;;  %v2570_v7 = vand.u32 2147483647, %v3538_v37 }
 0x36f   :  { %v3540_v31 = vpop.eup %3539 }
 0x370   :  { %3541 = vlog2.f32 %v2564_v17  ;;  %v2573_v60 = vadd.f32 1.0, %v3540_v31  ;;  %v2576_v14 = vmul.f32 -0.5, %v3540_v31  ;;  %v2568_v38 = vadd.f32 1.0, %v2567_v54 }
 0x371   :  { %v2579_v45 = vand.u32 2147483647, %v3540_v31  ;;  %vm2571_vm0 = vcmp.lt.f32.partialorder %v2570_v7, 0.0004427343 }
 0x372   :  { %3543 = vlog2.f32 %v2573_v60  ;;  %v2577_v52 = vadd.f32 1.0, %v2576_v14  ;;  %v2569_v34 = vmul.f32 %v3538_v37, %v2568_v38  ;;  %v2539_v37 = vrot.slane %v2519_v47, %v4564_v51 }
 0x373   :  { %vm2580_vm2 = vcmp.lt.f32.partialorder %v2579_v45, 0.0004427343 }
 0x374   :  { %v2578_v28 = vmul.f32 %v3540_v31, %v2577_v52 }
 0x37d   :  { %v3542_v36 = vpop.eup %3541 }
 0x37e   :  { %v2566_v46 = vmul.f32 0.6931472, %v3542_v36 }
 0x37f   :  { %v3544_v62 = vpop.eup %3543 }
 0x380   :  { %v2572_v40 = vsel %vm2571_vm0, %v2569_v34, %v2566_v46  ;;  %v2575_v10 = vmul.f32 0.6931472, %v3544_v62 }
 0x381   :  { %v2600_v33 = vadd.f32 %v2572_v40, %v2544_v39 }
 0x382   :  { %v2581_v18 = vsel %vm2580_vm2, %v2578_v28, %v2575_v10 }
 0x383   :  { %v2607_v5 = vsel %vm2606_vm1, %v2425_v42, %v2600_v33  ;;  %v2601_v59 = vadd.f32 %v2581_v18, %v2545_v25  ;;  %v2514_v42 = vsub.s32 5, %v4550_v57 }
 0x384   :  { %2611 = vst [vmem:[#allocation14] sm:$0xff] %v2607_v5 }
 0x385   :  { %v2608_v32 = vsel %vm2606_vm1, %v2427_v21, %v2601_v59  ;;  %v2515_v21 = vrot.slane %v4555_v16, %v2514_v42 }
 0x386   :  { %2612 = vst [vmem:[#allocation14 + $0x8] sm:$0xff] %v2608_v32 }
 0x387   :  { %v2535_v61 = vrot.slane %v2515_v21, %v4564_v51 }
 0x398   :  { %v2495_v55 = vpop.f32.mrf.mxu1 }
 0x399   :  { %v2496_v29 = vadd.f32 %v2495_v55, %v2353_v22 }
 0x39a   :  { %v2497_v26 = vpop.f32.mrf.mxu1 }
 0x39b   :  { %v2550_v56 = vand.u32 2147483647, %v2496_v29  ;;  %v2498_v11 = vadd.f32 %v2497_v26, %v2357_v8  ;;  %v2502_v17 = vmax.f32 %v2496_v29, 0.0  ;;  %v2542_v31 = vmul.f32 %v2535_v61, %v2496_v29 }
 0x39d   :  { %v2554_v0 = vsub.f32 0.0, %v2550_v56  ;;  %v2551_v44 = vand.u32 2147483647, %v2498_v11  ;;  %v2503_v4 = vmax.f32 %v2498_v11, 0.0  ;;  %v2543_v14 = vmul.f32 %v2539_v37, %v2498_v11 }
 0x39e   :  { %v2546_v63 = vsub.f32 %v2502_v17, %v2542_v31 }
 0x39f   :  { %v2560_v24 = vmul.f32 1.442695, %v2554_v0  ;;  %v2555_v41 = vsub.f32 0.0, %v2551_v44  ;;  %v2547_v1 = vsub.f32 %v2503_v4, %v2543_v14 }
 0x3a1   :  { %3545 = vpow2.f32 %v2560_v24  ;;  %v2562_v3 = vmul.f32 1.442695, %v2555_v41 }
 0x3a3   :  { %3547 = vpow2.f32 %v2562_v3 }
 0x3ae   :  { %v3546_v12 = vpop.eup %3545 }
 0x3af   :  { %v2582_v6 = vadd.f32 1.0, %v3546_v12  ;;  %v2585_v23 = vmul.f32 -0.5, %v3546_v12  ;;  %v2588_v60 = vand.u32 2147483647, %v3546_v12 }
 0x3b0   :  { %v3548_v35 = vpop.eup %3547 }
 0x3b1   :  { %3549 = vlog2.f32 %v2582_v6  ;;  %v2591_v19 = vadd.f32 1.0, %v3548_v35  ;;  %v2594_v48 = vmul.f32 -0.5, %v3548_v35  ;;  %v2586_v49 = vadd.f32 1.0, %v2585_v23 }
 0x3b2   :  { %v2597_v38 = vand.u32 2147483647, %v3548_v35  ;;  %vm2589_vm3 = vcmp.lt.f32.partialorder %v2588_v60, 0.0004427343 }
 0x3b3   :  { %3551 = vlog2.f32 %v2591_v19  ;;  %v2595_v54 = vadd.f32 1.0, %v2594_v48  ;;  %v2587_v2 = vmul.f32 %v3546_v12, %v2586_v49 }
 0x3b4   :  { %vm2598_vm4 = vcmp.lt.f32.partialorder %v2597_v38, 0.0004427343 }
 0x3b5   :  { %v2596_v36 = vmul.f32 %v3548_v35, %v2595_v54 }
 0x3be   :  { %v3550_v58 = vpop.eup %3549 }
 0x3bf   :  { %v2584_v13 = vmul.f32 0.6931472, %v3550_v58 }
 0x3c0   :  { %v3552_v15 = vpop.eup %3551 }
 0x3c1   :  { %v2590_v16 = vsel %vm2589_vm3, %v2587_v2, %v2584_v13  ;;  %v2593_v7 = vmul.f32 0.6931472, %v3552_v15 }
 0x3c2   :  { %v2602_v53 = vadd.f32 %v2590_v16, %v2546_v63 }
 0x3c3   :  { %v2599_v52 = vsel %vm2598_vm4, %v2596_v36, %v2593_v7 }
 0x3c4   :  { %v2609_v51 = vsel %vm2606_vm1, %v2496_v29, %v2602_v53  ;;  %v2603_v46 = vadd.f32 %v2599_v52, %v2547_v1 }
 0x3c5   :  { %2613 = vst [vmem:[#allocation14 + $0x10] sm:$0xff] %v2609_v51 }
 0x3c6   :  { %v2610_v34 = vsel %vm2606_vm1, %v2498_v11, %v2603_v46 }
 0x3c7   :  { %2614 = vst [vmem:[#allocation14 + $0x18] sm:$0xff] %v2610_v34 }
 0x3c8   :  { %3705 = shalt.err (!%p3702_p11)
}
 0x3c9   :  { %2624 = dma.vmem_to_hbm [thread:$0]  %s2622_s23, 512, %s4605_s9, [#allocation4]  }
 0x3ca   :  { %3722 = dma.done.wait [#allocation4], 512  }
 0x3cb   :  { %3723 = vsyncadd [#allocation4], 4294966784 }
 0x3cc   :  { %2628 = vsyncpa [#allocation3], 1 }
 0x3cd   :  { %2629 = vsyncpa [#allocation6], 1 }
 0x3ce   :  { %2630 = vsyncpa [#allocation9], 1 }
 0x3cf   :  { %2631 = vsyncpa [#allocation12], 1 }
 0x3d0   :  { %2632 = vsyncpa [#allocation4], 1 }

</bundles_post_ra>
